<compile_context>
chip_gen: v7x
topology: tpu7x:2x2x1
jax: 0.10.0
libtpu: 0.0.40
codegen_flags: <defaults>
</compile_context>

<pallas_src>
import numpy as np
import jax
import jax.numpy as jnp
from jax.experimental import pallas as pl
from jax.experimental.pallas import tpu as pltpu

# ---- model configuration (small, deterministic) ----
ALPHA = 0.3
BETA = 0.5
NUM_CLASSES = 2          # ES_Normalize columns are [1, 2] -> 2 classes
INPUT_SIZE = 4
ENC_HIDDEN = 32
DEC_HIDDEN = 32
NUM_LAYERS = 1           # module default; encoder and decoder share it
BATCH = 2
SEQ_LEN = 8
PREDICT_STEPS = 4

B_PAD = 8                # batch padded to one full sublane tile
F_PAD = 8                # features padded: [x0..x3, 1(ones), 0, 0, 0]

# ---- packed parameter buffer layout (rows of a (PACK_ROWS, 128) f32 array) --
M_ROWS   = SEQ_LEN * B_PAD + B_PAD                 # 72: beta∘alpha seq + alpha-last
O_M      = 0
O_WIH_E  = O_M + M_ROWS                            # 72  (8 rows: W_ih_enc + b_ih row)
O_WHH_E  = O_WIH_E + 8                             # 80  (32 rows)
O_BHH_E  = O_WHH_E + ENC_HIDDEN                    # 112 (8 rows, replicated bias)
O_WDEC   = O_BHH_E + 8                             # 120 (32 rows: [fci_w | W_ih_dec])
O_BDEC   = O_WDEC + ENC_HIDDEN                     # 152 (8 rows: [fci_b | b_ih_dec])
O_WHH_D  = O_BDEC + 8                              # 160 (32 rows)
O_BHH_D  = O_WHH_D + DEC_HIDDEN                    # 192 (8 rows, replicated bias)
O_FCW    = O_BHH_D + 8                             # 200 (32 rows)
O_DKRON  = O_FCW + DEC_HIDDEN                      # 232 (32 rows, denorm matrix)
O_BOUT   = O_DKRON + PREDICT_STEPS * B_PAD         # 264 (32 rows, denormed fc bias)
PACK_ROWS = O_BOUT + PREDICT_STEPS * B_PAD         # 296


# ----------------------------------------------------------------------------
# Host-side constants (built ONCE, outside the per-call path).
# ----------------------------------------------------------------------------
def _es_matrix(alpha, T):
    """S such that (S @ x_time_major)[i] == ES-smoothed value at step i."""
    S = np.zeros((T, T), np.float64)
    for i in range(T):
        S[i, 0] = alpha ** i
        for j in range(1, i + 1):
            S[i, j] = (1.0 - alpha) * alpha ** (i - j)
    return S


def _build_smoothing_matrix(alpha, beta, T, B):
    Sa = _es_matrix(alpha, T)                      # alpha smoothing
    Sb = _es_matrix(beta, T)                       # beta smoothing
    Sc = Sb @ Sa                                   # beta ∘ alpha
    eye = np.eye(B)
    m_comb = np.kron(Sc, eye)                      # (T*B, T*B): full smoothed seq
    m_alpha_last = np.kron(Sa[T - 1:T, :], eye)    # (B, T*B): alpha-smoothed last step
    return np.concatenate([m_comb, m_alpha_last], axis=0)   # row-stochastic


def _denorm_matrix(alpha, beta, P):
    """(P, P+2) matrix mapping [st12, st11, ys_0..ys_{P-1}] -> fully denormed out."""
    inv_b = 1.0 / (1.0 - beta)
    inv_a = 1.0 / (1.0 - alpha)
    Db = np.zeros((P, P + 2), np.float64)          # beta stage, on [st12, st11, ys]
    for p in range(P):
        Db[p, 2 + p] = inv_b
        if p == 0:
            Db[0, 0] = -beta * inv_b               # previous value = st12
        else:
            Db[p, 2 + p - 1] = -beta * inv_b       # previous value = ys[p-1]
    E = np.zeros((P + 1, P + 2), np.float64)       # build [st11, y2_0..y2_{P-1}]
    E[0, 1] = 1.0
    E[1:, :] = Db
    Da = np.zeros((P, P + 1), np.float64)          # alpha stage, on [st11, y2]
    for p in range(P):
        Da[p, 1 + p] = inv_a
        Da[p, p] = -alpha * inv_a                  # p==0 -> st11, else y2[p-1]
    return Da @ E


def pack_params(p):
    """Pack all weights/biases + constant matrices into one (296, 128) buffer."""
    rows = np.zeros((PACK_ROWS, 128), np.float32)

    # Both ES_Normalize stages + alpha-last state rows as one triangular matmul.
    rows[O_M:O_M + M_ROWS, :SEQ_LEN * B_PAD] = _build_smoothing_matrix(
        ALPHA, BETA, SEQ_LEN, B_PAD)

    # Encoder input projection; b_ih folded into the ones-column row (row F).
    rows[O_WIH_E:O_WIH_E + INPUT_SIZE, :3 * ENC_HIDDEN] = np.asarray(p['wih_e'])
    rows[O_WIH_E + INPUT_SIZE, :3 * ENC_HIDDEN] = np.asarray(p['bih_e'])[0]
    rows[O_WHH_E:O_WHH_E + ENC_HIDDEN, :3 * ENC_HIDDEN] = np.asarray(p['whh_e'])
    rows[O_BHH_E:O_BHH_E + B_PAD, :3 * ENC_HIDDEN] = np.tile(
        np.asarray(p['bhh_e']), (B_PAD, 1))

    # Decoder: fused [fc_init_hidden | W_ih_dec] (32x128) and its biases (8x128).
    rows[O_WDEC:O_WDEC + ENC_HIDDEN, :DEC_HIDDEN] = np.asarray(p['fci_w'])
    rows[O_WDEC:O_WDEC + ENC_HIDDEN, DEC_HIDDEN:4 * DEC_HIDDEN] = np.asarray(p['wih_d'])
    rows[O_BDEC:O_BDEC + B_PAD, :DEC_HIDDEN] = np.tile(np.asarray(p['fci_b']), (B_PAD, 1))
    rows[O_BDEC:O_BDEC + B_PAD, DEC_HIDDEN:4 * DEC_HIDDEN] = np.tile(
        np.asarray(p['bih_d']), (B_PAD, 1))
    rows[O_WHH_D:O_WHH_D + DEC_HIDDEN, :3 * DEC_HIDDEN] = np.asarray(p['whh_d'])
    rows[O_BHH_D:O_BHH_D + B_PAD, :3 * DEC_HIDDEN] = np.tile(
        np.asarray(p['bhh_d']), (B_PAD, 1))

    # Final linear weight (its bias is folded into the denorm output constant).
    rows[O_FCW:O_FCW + DEC_HIDDEN, :NUM_CLASSES] = np.asarray(p['fc_w'])

    # Fused two-stage denormalization matrix, kron'd with I_{B_PAD}.
    d_kron = np.kron(_denorm_matrix(ALPHA, BETA, PREDICT_STEPS), np.eye(B_PAD))
    rows[O_DKRON:O_DKRON + PREDICT_STEPS * B_PAD,
         :(PREDICT_STEPS + 2) * B_PAD] = d_kron

    # fc bias contribution pushed through the denorm matrix.
    bias_aug = np.concatenate(
        [np.zeros((2 * B_PAD, NUM_CLASSES)),
         np.tile(np.asarray(p['fc_b'], np.float64), (PREDICT_STEPS * B_PAD, 1))],
        axis=0)
    rows[O_BOUT:O_BOUT + PREDICT_STEPS * B_PAD, :NUM_CLASSES] = d_kron @ bias_aug

    return jnp.asarray(rows)


# ----------------------------------------------------------------------------
# GRU gate math (PyTorch ordering r, z, n). gi/gh already include their biases.
# ----------------------------------------------------------------------------
def _gru_gates(gi, gh, h, H):
    s = gi + gh
    rz = jax.nn.sigmoid(s[:, :2 * H])              # one EUP dispatch for r and z
    r = rz[:, :H]
    z = rz[:, H:2 * H]
    n = jnp.tanh(gi[:, 2 * H:] + r * gh[:, 2 * H:])
    return n + z * (h - n)                         # == (1-z)*n + z*h


# ----------------------------------------------------------------------------
# Kernel: whole forward pass at one grid point, everything in VMEM.
# ----------------------------------------------------------------------------
def _kernel(w_ref, x_ref, out_ref):
    BP, T, P = B_PAD, SEQ_LEN, PREDICT_STEPS
    HE, HD = ENC_HIDDEN, DEC_HIDDEN

    # --- both ES_Normalize recurrences as one constant triangular matmul ---
    # xs rows [0, T*BP)       : beta(alpha(x)) smoothed sequence, time-major
    # xs rows [T*BP, T*BP+BP) : alpha(x) smoothed, last time step
    # column F (=4) of x is all-ones -> xs column 4 is all-ones (row-stochastic
    # smoothing matrix), which folds b_ih_enc into the input projection below.
    m_all = w_ref[O_M:O_M + M_ROWS, 0:T * BP]
    xs = jnp.dot(m_all, x_ref[...], preferred_element_type=jnp.float32)   # (72, 8)
    st_cat = xs[(T - 1) * BP:(T + 1) * BP, 1:3]    # (16, 2): [st12 ; st11]

    # --- encoder GRU: all T input projections (+ bias) in one matmul ---
    gi_all = jnp.dot(xs[:T * BP, :], w_ref[O_WIH_E:O_WIH_E + F_PAD, 0:3 * HE],
                     preferred_element_type=jnp.float32)                  # (64, 96)
    whh_e = w_ref[O_WHH_E:O_WHH_E + HE, 0:3 * HE]
    bhh_e = w_ref[O_BHH_E:O_BHH_E + BP, 0:3 * HE]  # pre-replicated, no broadcast

    h = jnp.zeros((BP, HE), jnp.float32)
    for t in range(T):
        gi = gi_all[t * BP:(t + 1) * BP, :]
        gh = jnp.dot(h, whh_e, preferred_element_type=jnp.float32) + bhh_e
        h = _gru_gates(gi, gh, h, HE)
    h_enc = h                                      # num_layers == 1 -> no concat

    # --- fc_init_hidden + decoder input projection fused: one 128-lane matmul ---
    fused = jnp.dot(h_enc, w_ref[O_WDEC:O_WDEC + HE, 0:4 * HD],
                    preferred_element_type=jnp.float32) \
        + w_ref[O_BDEC:O_BDEC + BP, 0:4 * HD]
    h_d = fused[:, :HD]
    gi_d = fused[:, HD:]                           # loop-invariant decoder input proj
    whh_d = w_ref[O_WHH_D:O_WHH_D + HD, 0:3 * HD]
    bhh_d = w_ref[O_BHH_D:O_BHH_D + BP, 0:3 * HD]

    hs = []
    for _ in range(P):
        gh = jnp.dot(h_d, whh_d, preferred_element_type=jnp.float32) + bhh_d
        h_d = _gru_gates(gi_d, gh, h_d, HD)
        hs.append(h_d)
    h_stack = jnp.concatenate(hs, axis=0)          # (P*BP, HD), step-major, aligned

    # --- final linear (no bias) + BOTH ES_DeNormalize stages as one matmul ---
    ys = jnp.dot(h_stack, w_ref[O_FCW:O_FCW + HD, 0:NUM_CLASSES],
                 preferred_element_type=jnp.float32)                      # (32, 2)
    aug = jnp.concatenate([st_cat, ys], axis=0)                           # (48, 2)
    out = jnp.dot(w_ref[O_DKRON:O_DKRON + P * BP, 0:(P + 2) * BP], aug,
                  preferred_element_type=jnp.float32) \
        + w_ref[O_BOUT:O_BOUT + P * BP, 0:NUM_CLASSES]
    out_ref[...] = out                             # (P*BP, NC) step-major slab


# ----------------------------------------------------------------------------
# Wrapper (jitted): pad/transpose x, one pallas_call (2 DMAs), reshape output.
# ----------------------------------------------------------------------------
@jax.jit
def timeseries_forward_pallas(x, packed):
    B, T, F = x.shape
    xt = jnp.transpose(x, (1, 0, 2))                                  # (T, B, F)
    xt = jnp.pad(xt, ((0, 0), (0, B_PAD - B), (0, 0)))                # (T, BP, F)
    ones = jnp.ones((T, B_PAD, 1), x.dtype)                           # bias column
    zpad = jnp.zeros((T, B_PAD, F_PAD - F - 1), x.dtype)
    x_pad = jnp.concatenate([xt, ones, zpad], axis=-1).reshape(T * B_PAD, F_PAD)

    vmem = pl.BlockSpec(memory_space=pltpu.MemorySpace.VMEM)
    # TODO(synk): if BATCH is ever scaled up, add a batch grid axis with
    # dimension_semantics=("parallel",) so both v7x TensorCores are used.
    out = pl.pallas_call(
        _kernel,
        out_shape=jax.ShapeDtypeStruct((PREDICT_STEPS * B_PAD, NUM_CLASSES),
                                       jnp.float32),
        in_specs=[vmem, vmem],
        out_specs=vmem,
    )(packed, x_pad)

    out = out.reshape(PREDICT_STEPS, B_PAD, NUM_CLASSES)[:, :B, :]
    return jnp.transpose(out, (1, 0, 2)).reshape(B, PREDICT_STEPS * NUM_CLASSES)


# ----------------------------------------------------------------------------
# Deterministic parameter init (PyTorch-style uniform ranges), kernel layout:
# transposed weights, 2-D biases.
# ----------------------------------------------------------------------------
def init_params(key):
    keys = iter(jax.random.split(key, 32))

    def uni(shape, bound):
        return jax.random.uniform(next(keys), shape, jnp.float32, -bound, bound)

    def gru_layer(in_dim, hidden):
        k = 1.0 / np.sqrt(hidden)
        wih = uni((3 * hidden, in_dim), k)      # PyTorch layout (3H, in)
        whh = uni((3 * hidden, hidden), k)
        bih = uni((3 * hidden,), k)
        bhh = uni((3 * hidden,), k)
        return wih.T, whh.T, bih[None, :], bhh[None, :]

    p = {}
    p['wih_e'], p['whh_e'], p['bih_e'], p['bhh_e'] = gru_layer(INPUT_SIZE, ENC_HIDDEN)
    p['wih_d'], p['whh_d'], p['bih_d'], p['bhh_d'] = gru_layer(
        ENC_HIDDEN * NUM_LAYERS, DEC_HIDDEN)

    k = 1.0 / np.sqrt(ENC_HIDDEN)
    p['fci_w'] = uni((DEC_HIDDEN, ENC_HIDDEN), k).T   # (HE, HD)
    p['fci_b'] = uni((DEC_HIDDEN,), k)[None, :]

    k = 1.0 / np.sqrt(DEC_HIDDEN)
    p['fc_w'] = uni((NUM_CLASSES, DEC_HIDDEN), k).T   # (HD, NC)
    p['fc_b'] = uni((NUM_CLASSES,), k)[None, :]
    return p


# ----------------------------------------------------------------------------
# Pure-JAX reference (mirrors the PyTorch forward step-by-step; independent of
# the kernel's batched / matrix-smoothing formulation).
# ----------------------------------------------------------------------------
def _reference_forward(x, p):
    B, T, _ = x.shape
    HE, HD, P = ENC_HIDDEN, DEC_HIDDEN, PREDICT_STEPS

    def gru_cell(inp, h, wih, whh, bih, bhh, H):
        gi = jnp.dot(inp, wih) + bih
        gh = jnp.dot(h, whh) + bhh
        r = jax.nn.sigmoid(gi[:, :H] + gh[:, :H])
        z = jax.nn.sigmoid(gi[:, H:2 * H] + gh[:, H:2 * H])
        n = jnp.tanh(gi[:, 2 * H:] + r * gh[:, 2 * H:])
        return (1.0 - z) * n + z * h

    # ES_Normalize(alpha) then ES_Normalize(beta)
    xs1 = [x[:, 0, :]]
    for i in range(1, T):
        xs1.append((1.0 - ALPHA) * x[:, i, :] + ALPHA * xs1[-1])
    st11 = xs1[-1][:, 1:3]
    xs2 = [xs1[0]]
    for i in range(1, T):
        xs2.append((1.0 - BETA) * xs1[i] + BETA * xs2[-1])
    st12 = xs2[-1][:, 1:3]

    # encoder GRU, h0 = 0
    h = jnp.zeros((B, HE), jnp.float32)
    for t in range(T):
        h = gru_cell(xs2[t], h, p['wih_e'], p['whh_e'], p['bih_e'], p['bhh_e'], HE)
    h_enc = h

    # fc_init_hidden_status, decoder over predict steps (input = repeated h_enc)
    h_d = jnp.dot(h_enc, p['fci_w']) + p['fci_b']
    ys = []
    for _ in range(P):
        h_d = gru_cell(h_enc, h_d, p['wih_d'], p['whh_d'], p['bih_d'], p['bhh_d'], HD)
        ys.append(jnp.dot(h_d, p['fc_w']) + p['fc_b'])

    # denormalize beta, then alpha (st holds pre-denorm values)
    s2 = [st12] + ys[:-1]
    y2 = [(ys[i] - BETA * s2[i]) / (1.0 - BETA) for i in range(P)]
    s1 = [st11] + y2[:-1]
    y3 = [(y2[i] - ALPHA * s1[i]) / (1.0 - ALPHA) for i in range(P)]
    return jnp.concatenate(y3, axis=1)


if __name__ == "__main__":
    key = jax.random.PRNGKey(0)
    k_x, k_p = jax.random.split(key)
    x = jax.random.normal(k_x, (BATCH, SEQ_LEN, INPUT_SIZE), jnp.float32)
    params = init_params(k_p)
    packed = pack_params(params)          # one-time packing (host side)

    out = timeseries_forward_pallas(x, packed)
    out = jax.block_until_ready(out)

    ref = jax.jit(lambda xx: _reference_forward(xx, params))(x)
    ref = jax.block_until_ready(ref)

    assert out.shape == (BATCH, PREDICT_STEPS * NUM_CLASSES)
    assert np.allclose(np.asarray(out), np.asarray(ref), rtol=1e-2, atol=1e-2), (
        float(np.max(np.abs(np.asarray(out) - np.asarray(ref)))))
    print("KERNEL_OK")
</pallas_src>

<mosaic_0001>
module attributes {stable_mosaic.version = 11 : i64} {
  func.func @_kernel(%arg0: memref<296x128xf32, #tpu.memory_space<vmem>>, %arg1: memref<64x8xf32, #tpu.memory_space<vmem>>, %arg2: memref<32x2xf32, #tpu.memory_space<vmem>>) attributes {dimension_semantics = [], scalar_prefetch = 0 : i64, scratch_operands = 0 : i64, tpu.core_type = #tpu.core_type<tc>} {
    %c0 = arith.constant 0 : index
    %c0_0 = arith.constant 0 : index
    %0 = vector.load %arg0[%c0, %c0_0] : memref<296x128xf32, #tpu.memory_space<vmem>>, vector<72x64xf32>
    %c0_1 = arith.constant 0 : index
    %c0_2 = arith.constant 0 : index
    %1 = vector.load %arg1[%c0_1, %c0_2] : memref<64x8xf32, #tpu.memory_space<vmem>>, vector<64x8xf32>
    %cst = arith.constant dense<0.000000e+00> : vector<72x8xf32>
    %2 = tpu.matmul %0, %1, %cst {dimension_numbers = #tpu.dot_dimension_numbers<[1], [0], [0], [1], [0, 0, 1, 1], [], []>} : vector<72x64xf32>, vector<64x8xf32>, vector<72x8xf32> -> vector<72x8xf32>
    %3 = vector.extract_strided_slice %2 {offsets = [56, 1], sizes = [16, 2], strides = [1, 1]} : vector<72x8xf32> to vector<16x2xf32>
    %4 = vector.extract_strided_slice %2 {offsets = [0, 0], sizes = [64, 8], strides = [1, 1]} : vector<72x8xf32> to vector<64x8xf32>
    %c72 = arith.constant 72 : index
    %c0_3 = arith.constant 0 : index
    %5 = vector.load %arg0[%c72, %c0_3] : memref<296x128xf32, #tpu.memory_space<vmem>>, vector<8x96xf32>
    %cst_4 = arith.constant dense<0.000000e+00> : vector<64x96xf32>
    %6 = tpu.matmul %4, %5, %cst_4 {dimension_numbers = #tpu.dot_dimension_numbers<[1], [0], [0], [1], [0, 0, 1, 1], [], []>} : vector<64x8xf32>, vector<8x96xf32>, vector<64x96xf32> -> vector<64x96xf32>
    %c80 = arith.constant 80 : index
    %c0_5 = arith.constant 0 : index
    %7 = vector.load %arg0[%c80, %c0_5] : memref<296x128xf32, #tpu.memory_space<vmem>>, vector<32x96xf32>
    %c112 = arith.constant 112 : index
    %c0_6 = arith.constant 0 : index
    %8 = vector.load %arg0[%c112, %c0_6] : memref<296x128xf32, #tpu.memory_space<vmem>>, vector<8x96xf32>
    %cst_7 = arith.constant 0.000000e+00 : f32
    %9 = vector.broadcast %cst_7 : f32 to vector<8x32xf32>
    %10 = vector.extract_strided_slice %6 {offsets = [0, 0], sizes = [8, 96], strides = [1, 1]} : vector<64x96xf32> to vector<8x96xf32>
    %cst_8 = arith.constant dense<0.000000e+00> : vector<8x96xf32>
    %11 = tpu.matmul %9, %7, %cst_8 {dimension_numbers = #tpu.dot_dimension_numbers<[1], [0], [0], [1], [0, 0, 1, 1], [], []>} : vector<8x32xf32>, vector<32x96xf32>, vector<8x96xf32> -> vector<8x96xf32>
    %12 = arith.addf %11, %8 : vector<8x96xf32>
    %13 = arith.addf %10, %12 : vector<8x96xf32>
    %14 = vector.extract_strided_slice %13 {offsets = [0, 0], sizes = [8, 64], strides = [1, 1]} : vector<8x96xf32> to vector<8x64xf32>
    %15 = arith.negf %14 : vector<8x64xf32>
    %16 = math.exp %15 : vector<8x64xf32>
    %cst_9 = arith.constant 1.000000e+00 : f32
    %17 = vector.broadcast %cst_9 : f32 to vector<8x64xf32>
    %18 = arith.addf %17, %16 : vector<8x64xf32>
    %19 = arith.divf %17, %18 : vector<8x64xf32>
    %20 = vector.extract_strided_slice %19 {offsets = [0, 0], sizes = [8, 32], strides = [1, 1]} : vector<8x64xf32> to vector<8x32xf32>
    %21 = vector.extract_strided_slice %19 {offsets = [0, 32], sizes = [8, 32], strides = [1, 1]} : vector<8x64xf32> to vector<8x32xf32>
    %22 = vector.extract_strided_slice %10 {offsets = [0, 64], sizes = [8, 32], strides = [1, 1]} : vector<8x96xf32> to vector<8x32xf32>
    %23 = vector.extract_strided_slice %12 {offsets = [0, 64], sizes = [8, 32], strides = [1, 1]} : vector<8x96xf32> to vector<8x32xf32>
    %24 = arith.mulf %20, %23 : vector<8x32xf32>
    %25 = arith.addf %22, %24 : vector<8x32xf32>
    %26 = math.tanh %25 : vector<8x32xf32>
    %27 = arith.subf %9, %26 : vector<8x32xf32>
    %28 = arith.mulf %21, %27 : vector<8x32xf32>
    %29 = arith.addf %26, %28 : vector<8x32xf32>
    %30 = vector.extract_strided_slice %6 {offsets = [8, 0], sizes = [8, 96], strides = [1, 1]} : vector<64x96xf32> to vector<8x96xf32>
    %cst_10 = arith.constant dense<0.000000e+00> : vector<8x96xf32>
    %31 = tpu.matmul %29, %7, %cst_10 {dimension_numbers = #tpu.dot_dimension_numbers<[1], [0], [0], [1], [0, 0, 1, 1], [], []>} : vector<8x32xf32>, vector<32x96xf32>, vector<8x96xf32> -> vector<8x96xf32>
    %32 = arith.addf %31, %8 : vector<8x96xf32>
    %33 = arith.addf %30, %32 : vector<8x96xf32>
    %34 = vector.extract_strided_slice %33 {offsets = [0, 0], sizes = [8, 64], strides = [1, 1]} : vector<8x96xf32> to vector<8x64xf32>
    %35 = arith.negf %34 : vector<8x64xf32>
    %36 = math.exp %35 : vector<8x64xf32>
    %cst_11 = arith.constant 1.000000e+00 : f32
    %37 = vector.broadcast %cst_11 : f32 to vector<8x64xf32>
    %38 = arith.addf %37, %36 : vector<8x64xf32>
    %39 = arith.divf %37, %38 : vector<8x64xf32>
    %40 = vector.extract_strided_slice %39 {offsets = [0, 0], sizes = [8, 32], strides = [1, 1]} : vector<8x64xf32> to vector<8x32xf32>
    %41 = vector.extract_strided_slice %39 {offsets = [0, 32], sizes = [8, 32], strides = [1, 1]} : vector<8x64xf32> to vector<8x32xf32>
    %42 = vector.extract_strided_slice %30 {offsets = [0, 64], sizes = [8, 32], strides = [1, 1]} : vector<8x96xf32> to vector<8x32xf32>
    %43 = vector.extract_strided_slice %32 {offsets = [0, 64], sizes = [8, 32], strides = [1, 1]} : vector<8x96xf32> to vector<8x32xf32>
    %44 = arith.mulf %40, %43 : vector<8x32xf32>
    %45 = arith.addf %42, %44 : vector<8x32xf32>
    %46 = math.tanh %45 : vector<8x32xf32>
    %47 = arith.subf %29, %46 : vector<8x32xf32>
    %48 = arith.mulf %41, %47 : vector<8x32xf32>
    %49 = arith.addf %46, %48 : vector<8x32xf32>
    %50 = vector.extract_strided_slice %6 {offsets = [16, 0], sizes = [8, 96], strides = [1, 1]} : vector<64x96xf32> to vector<8x96xf32>
    %cst_12 = arith.constant dense<0.000000e+00> : vector<8x96xf32>
    %51 = tpu.matmul %49, %7, %cst_12 {dimension_numbers = #tpu.dot_dimension_numbers<[1], [0], [0], [1], [0, 0, 1, 1], [], []>} : vector<8x32xf32>, vector<32x96xf32>, vector<8x96xf32> -> vector<8x96xf32>
    %52 = arith.addf %51, %8 : vector<8x96xf32>
    %53 = arith.addf %50, %52 : vector<8x96xf32>
    %54 = vector.extract_strided_slice %53 {offsets = [0, 0], sizes = [8, 64], strides = [1, 1]} : vector<8x96xf32> to vector<8x64xf32>
    %55 = arith.negf %54 : vector<8x64xf32>
    %56 = math.exp %55 : vector<8x64xf32>
    %cst_13 = arith.constant 1.000000e+00 : f32
    %57 = vector.broadcast %cst_13 : f32 to vector<8x64xf32>
    %58 = arith.addf %57, %56 : vector<8x64xf32>
    %59 = arith.divf %57, %58 : vector<8x64xf32>
    %60 = vector.extract_strided_slice %59 {offsets = [0, 0], sizes = [8, 32], strides = [1, 1]} : vector<8x64xf32> to vector<8x32xf32>
    %61 = vector.extract_strided_slice %59 {offsets = [0, 32], sizes = [8, 32], strides = [1, 1]} : vector<8x64xf32> to vector<8x32xf32>
    %62 = vector.extract_strided_slice %50 {offsets = [0, 64], sizes = [8, 32], strides = [1, 1]} : vector<8x96xf32> to vector<8x32xf32>
    %63 = vector.extract_strided_slice %52 {offsets = [0, 64], sizes = [8, 32], strides = [1, 1]} : vector<8x96xf32> to vector<8x32xf32>
    %64 = arith.mulf %60, %63 : vector<8x32xf32>
    %65 = arith.addf %62, %64 : vector<8x32xf32>
    %66 = math.tanh %65 : vector<8x32xf32>
    %67 = arith.subf %49, %66 : vector<8x32xf32>
    %68 = arith.mulf %61, %67 : vector<8x32xf32>
    %69 = arith.addf %66, %68 : vector<8x32xf32>
    %70 = vector.extract_strided_slice %6 {offsets = [24, 0], sizes = [8, 96], strides = [1, 1]} : vector<64x96xf32> to vector<8x96xf32>
    %cst_14 = arith.constant dense<0.000000e+00> : vector<8x96xf32>
    %71 = tpu.matmul %69, %7, %cst_14 {dimension_numbers = #tpu.dot_dimension_numbers<[1], [0], [0], [1], [0, 0, 1, 1], [], []>} : vector<8x32xf32>, vector<32x96xf32>, vector<8x96xf32> -> vector<8x96xf32>
    %72 = arith.addf %71, %8 : vector<8x96xf32>
    %73 = arith.addf %70, %72 : vector<8x96xf32>
    %74 = vector.extract_strided_slice %73 {offsets = [0, 0], sizes = [8, 64], strides = [1, 1]} : vector<8x96xf32> to vector<8x64xf32>
    %75 = arith.negf %74 : vector<8x64xf32>
    %76 = math.exp %75 : vector<8x64xf32>
    %cst_15 = arith.constant 1.000000e+00 : f32
    %77 = vector.broadcast %cst_15 : f32 to vector<8x64xf32>
    %78 = arith.addf %77, %76 : vector<8x64xf32>
    %79 = arith.divf %77, %78 : vector<8x64xf32>
    %80 = vector.extract_strided_slice %79 {offsets = [0, 0], sizes = [8, 32], strides = [1, 1]} : vector<8x64xf32> to vector<8x32xf32>
    %81 = vector.extract_strided_slice %79 {offsets = [0, 32], sizes = [8, 32], strides = [1, 1]} : vector<8x64xf32> to vector<8x32xf32>
    %82 = vector.extract_strided_slice %70 {offsets = [0, 64], sizes = [8, 32], strides = [1, 1]} : vector<8x96xf32> to vector<8x32xf32>
    %83 = vector.extract_strided_slice %72 {offsets = [0, 64], sizes = [8, 32], strides = [1, 1]} : vector<8x96xf32> to vector<8x32xf32>
    %84 = arith.mulf %80, %83 : vector<8x32xf32>
    %85 = arith.addf %82, %84 : vector<8x32xf32>
    %86 = math.tanh %85 : vector<8x32xf32>
    %87 = arith.subf %69, %86 : vector<8x32xf32>
    %88 = arith.mulf %81, %87 : vector<8x32xf32>
    %89 = arith.addf %86, %88 : vector<8x32xf32>
    %90 = vector.extract_strided_slice %6 {offsets = [32, 0], sizes = [8, 96], strides = [1, 1]} : vector<64x96xf32> to vector<8x96xf32>
    %cst_16 = arith.constant dense<0.000000e+00> : vector<8x96xf32>
    %91 = tpu.matmul %89, %7, %cst_16 {dimension_numbers = #tpu.dot_dimension_numbers<[1], [0], [0], [1], [0, 0, 1, 1], [], []>} : vector<8x32xf32>, vector<32x96xf32>, vector<8x96xf32> -> vector<8x96xf32>
    %92 = arith.addf %91, %8 : vector<8x96xf32>
    %93 = arith.addf %90, %92 : vector<8x96xf32>
    %94 = vector.extract_strided_slice %93 {offsets = [0, 0], sizes = [8, 64], strides = [1, 1]} : vector<8x96xf32> to vector<8x64xf32>
    %95 = arith.negf %94 : vector<8x64xf32>
    %96 = math.exp %95 : vector<8x64xf32>
    %cst_17 = arith.constant 1.000000e+00 : f32
    %97 = vector.broadcast %cst_17 : f32 to vector<8x64xf32>
    %98 = arith.addf %97, %96 : vector<8x64xf32>
    %99 = arith.divf %97, %98 : vector<8x64xf32>
    %100 = vector.extract_strided_slice %99 {offsets = [0, 0], sizes = [8, 32], strides = [1, 1]} : vector<8x64xf32> to vector<8x32xf32>
    %101 = vector.extract_strided_slice %99 {offsets = [0, 32], sizes = [8, 32], strides = [1, 1]} : vector<8x64xf32> to vector<8x32xf32>
    %102 = vector.extract_strided_slice %90 {offsets = [0, 64], sizes = [8, 32], strides = [1, 1]} : vector<8x96xf32> to vector<8x32xf32>
    %103 = vector.extract_strided_slice %92 {offsets = [0, 64], sizes = [8, 32], strides = [1, 1]} : vector<8x96xf32> to vector<8x32xf32>
    %104 = arith.mulf %100, %103 : vector<8x32xf32>
    %105 = arith.addf %102, %104 : vector<8x32xf32>
    %106 = math.tanh %105 : vector<8x32xf32>
    %107 = arith.subf %89, %106 : vector<8x32xf32>
    %108 = arith.mulf %101, %107 : vector<8x32xf32>
    %109 = arith.addf %106, %108 : vector<8x32xf32>
    %110 = vector.extract_strided_slice %6 {offsets = [40, 0], sizes = [8, 96], strides = [1, 1]} : vector<64x96xf32> to vector<8x96xf32>
    %cst_18 = arith.constant dense<0.000000e+00> : vector<8x96xf32>
    %111 = tpu.matmul %109, %7, %cst_18 {dimension_numbers = #tpu.dot_dimension_numbers<[1], [0], [0], [1], [0, 0, 1, 1], [], []>} : vector<8x32xf32>, vector<32x96xf32>, vector<8x96xf32> -> vector<8x96xf32>
    %112 = arith.addf %111, %8 : vector<8x96xf32>
    %113 = arith.addf %110, %112 : vector<8x96xf32>
    %114 = vector.extract_strided_slice %113 {offsets = [0, 0], sizes = [8, 64], strides = [1, 1]} : vector<8x96xf32> to vector<8x64xf32>
    %115 = arith.negf %114 : vector<8x64xf32>
    %116 = math.exp %115 : vector<8x64xf32>
    %cst_19 = arith.constant 1.000000e+00 : f32
    %117 = vector.broadcast %cst_19 : f32 to vector<8x64xf32>
    %118 = arith.addf %117, %116 : vector<8x64xf32>
    %119 = arith.divf %117, %118 : vector<8x64xf32>
    %120 = vector.extract_strided_slice %119 {offsets = [0, 0], sizes = [8, 32], strides = [1, 1]} : vector<8x64xf32> to vector<8x32xf32>
    %121 = vector.extract_strided_slice %119 {offsets = [0, 32], sizes = [8, 32], strides = [1, 1]} : vector<8x64xf32> to vector<8x32xf32>
    %122 = vector.extract_strided_slice %110 {offsets = [0, 64], sizes = [8, 32], strides = [1, 1]} : vector<8x96xf32> to vector<8x32xf32>
    %123 = vector.extract_strided_slice %112 {offsets = [0, 64], sizes = [8, 32], strides = [1, 1]} : vector<8x96xf32> to vector<8x32xf32>
    %124 = arith.mulf %120, %123 : vector<8x32xf32>
    %125 = arith.addf %122, %124 : vector<8x32xf32>
    %126 = math.tanh %125 : vector<8x32xf32>
    %127 = arith.subf %109, %126 : vector<8x32xf32>
    %128 = arith.mulf %121, %127 : vector<8x32xf32>
    %129 = arith.addf %126, %128 : vector<8x32xf32>
    %130 = vector.extract_strided_slice %6 {offsets = [48, 0], sizes = [8, 96], strides = [1, 1]} : vector<64x96xf32> to vector<8x96xf32>
    %cst_20 = arith.constant dense<0.000000e+00> : vector<8x96xf32>
    %131 = tpu.matmul %129, %7, %cst_20 {dimension_numbers = #tpu.dot_dimension_numbers<[1], [0], [0], [1], [0, 0, 1, 1], [], []>} : vector<8x32xf32>, vector<32x96xf32>, vector<8x96xf32> -> vector<8x96xf32>
    %132 = arith.addf %131, %8 : vector<8x96xf32>
    %133 = arith.addf %130, %132 : vector<8x96xf32>
    %134 = vector.extract_strided_slice %133 {offsets = [0, 0], sizes = [8, 64], strides = [1, 1]} : vector<8x96xf32> to vector<8x64xf32>
    %135 = arith.negf %134 : vector<8x64xf32>
    %136 = math.exp %135 : vector<8x64xf32>
    %cst_21 = arith.constant 1.000000e+00 : f32
    %137 = vector.broadcast %cst_21 : f32 to vector<8x64xf32>
    %138 = arith.addf %137, %136 : vector<8x64xf32>
    %139 = arith.divf %137, %138 : vector<8x64xf32>
    %140 = vector.extract_strided_slice %139 {offsets = [0, 0], sizes = [8, 32], strides = [1, 1]} : vector<8x64xf32> to vector<8x32xf32>
    %141 = vector.extract_strided_slice %139 {offsets = [0, 32], sizes = [8, 32], strides = [1, 1]} : vector<8x64xf32> to vector<8x32xf32>
    %142 = vector.extract_strided_slice %130 {offsets = [0, 64], sizes = [8, 32], strides = [1, 1]} : vector<8x96xf32> to vector<8x32xf32>
    %143 = vector.extract_strided_slice %132 {offsets = [0, 64], sizes = [8, 32], strides = [1, 1]} : vector<8x96xf32> to vector<8x32xf32>
    %144 = arith.mulf %140, %143 : vector<8x32xf32>
    %145 = arith.addf %142, %144 : vector<8x32xf32>
    %146 = math.tanh %145 : vector<8x32xf32>
    %147 = arith.subf %129, %146 : vector<8x32xf32>
    %148 = arith.mulf %141, %147 : vector<8x32xf32>
    %149 = arith.addf %146, %148 : vector<8x32xf32>
    %150 = vector.extract_strided_slice %6 {offsets = [56, 0], sizes = [8, 96], strides = [1, 1]} : vector<64x96xf32> to vector<8x96xf32>
    %cst_22 = arith.constant dense<0.000000e+00> : vector<8x96xf32>
    %151 = tpu.matmul %149, %7, %cst_22 {dimension_numbers = #tpu.dot_dimension_numbers<[1], [0], [0], [1], [0, 0, 1, 1], [], []>} : vector<8x32xf32>, vector<32x96xf32>, vector<8x96xf32> -> vector<8x96xf32>
    %152 = arith.addf %151, %8 : vector<8x96xf32>
    %153 = arith.addf %150, %152 : vector<8x96xf32>
    %154 = vector.extract_strided_slice %153 {offsets = [0, 0], sizes = [8, 64], strides = [1, 1]} : vector<8x96xf32> to vector<8x64xf32>
    %155 = arith.negf %154 : vector<8x64xf32>
    %156 = math.exp %155 : vector<8x64xf32>
    %cst_23 = arith.constant 1.000000e+00 : f32
    %157 = vector.broadcast %cst_23 : f32 to vector<8x64xf32>
    %158 = arith.addf %157, %156 : vector<8x64xf32>
    %159 = arith.divf %157, %158 : vector<8x64xf32>
    %160 = vector.extract_strided_slice %159 {offsets = [0, 0], sizes = [8, 32], strides = [1, 1]} : vector<8x64xf32> to vector<8x32xf32>
    %161 = vector.extract_strided_slice %159 {offsets = [0, 32], sizes = [8, 32], strides = [1, 1]} : vector<8x64xf32> to vector<8x32xf32>
    %162 = vector.extract_strided_slice %150 {offsets = [0, 64], sizes = [8, 32], strides = [1, 1]} : vector<8x96xf32> to vector<8x32xf32>
    %163 = vector.extract_strided_slice %152 {offsets = [0, 64], sizes = [8, 32], strides = [1, 1]} : vector<8x96xf32> to vector<8x32xf32>
    %164 = arith.mulf %160, %163 : vector<8x32xf32>
    %165 = arith.addf %162, %164 : vector<8x32xf32>
    %166 = math.tanh %165 : vector<8x32xf32>
    %167 = arith.subf %149, %166 : vector<8x32xf32>
    %168 = arith.mulf %161, %167 : vector<8x32xf32>
    %169 = arith.addf %166, %168 : vector<8x32xf32>
    %c120 = arith.constant 120 : index
    %c0_24 = arith.constant 0 : index
    %170 = vector.load %arg0[%c120, %c0_24] : memref<296x128xf32, #tpu.memory_space<vmem>>, vector<32x128xf32>
    %cst_25 = arith.constant dense<0.000000e+00> : vector<8x128xf32>
    %171 = tpu.matmul %169, %170, %cst_25 {dimension_numbers = #tpu.dot_dimension_numbers<[1], [0], [0], [1], [0, 0, 1, 1], [], []>} : vector<8x32xf32>, vector<32x128xf32>, vector<8x128xf32> -> vector<8x128xf32>
    %c152 = arith.constant 152 : index
    %c0_26 = arith.constant 0 : index
    %172 = vector.load %arg0[%c152, %c0_26] : memref<296x128xf32, #tpu.memory_space<vmem>>, vector<8x128xf32>
    %173 = arith.addf %171, %172 : vector<8x128xf32>
    %174 = vector.extract_strided_slice %173 {offsets = [0, 0], sizes = [8, 32], strides = [1, 1]} : vector<8x128xf32> to vector<8x32xf32>
    %175 = vector.extract_strided_slice %173 {offsets = [0, 32], sizes = [8, 96], strides = [1, 1]} : vector<8x128xf32> to vector<8x96xf32>
    %c160 = arith.constant 160 : index
    %c0_27 = arith.constant 0 : index
    %176 = vector.load %arg0[%c160, %c0_27] : memref<296x128xf32, #tpu.memory_space<vmem>>, vector<32x96xf32>
    %c192 = arith.constant 192 : index
    %c0_28 = arith.constant 0 : index
    %177 = vector.load %arg0[%c192, %c0_28] : memref<296x128xf32, #tpu.memory_space<vmem>>, vector<8x96xf32>
    %cst_29 = arith.constant dense<0.000000e+00> : vector<8x96xf32>
    %178 = tpu.matmul %174, %176, %cst_29 {dimension_numbers = #tpu.dot_dimension_numbers<[1], [0], [0], [1], [0, 0, 1, 1], [], []>} : vector<8x32xf32>, vector<32x96xf32>, vector<8x96xf32> -> vector<8x96xf32>
    %179 = arith.addf %178, %177 : vector<8x96xf32>
    %180 = arith.addf %175, %179 : vector<8x96xf32>
    %181 = vector.extract_strided_slice %180 {offsets = [0, 0], sizes = [8, 64], strides = [1, 1]} : vector<8x96xf32> to vector<8x64xf32>
    %182 = arith.negf %181 : vector<8x64xf32>
    %183 = math.exp %182 : vector<8x64xf32>
    %cst_30 = arith.constant 1.000000e+00 : f32
    %184 = vector.broadcast %cst_30 : f32 to vector<8x64xf32>
    %185 = arith.addf %184, %183 : vector<8x64xf32>
    %186 = arith.divf %184, %185 : vector<8x64xf32>
    %187 = vector.extract_strided_slice %186 {offsets = [0, 0], sizes = [8, 32], strides = [1, 1]} : vector<8x64xf32> to vector<8x32xf32>
    %188 = vector.extract_strided_slice %186 {offsets = [0, 32], sizes = [8, 32], strides = [1, 1]} : vector<8x64xf32> to vector<8x32xf32>
    %189 = vector.extract_strided_slice %175 {offsets = [0, 64], sizes = [8, 32], strides = [1, 1]} : vector<8x96xf32> to vector<8x32xf32>
    %190 = vector.extract_strided_slice %179 {offsets = [0, 64], sizes = [8, 32], strides = [1, 1]} : vector<8x96xf32> to vector<8x32xf32>
    %191 = arith.mulf %187, %190 : vector<8x32xf32>
    %192 = arith.addf %189, %191 : vector<8x32xf32>
    %193 = math.tanh %192 : vector<8x32xf32>
    %194 = arith.subf %174, %193 : vector<8x32xf32>
    %195 = arith.mulf %188, %194 : vector<8x32xf32>
    %196 = arith.addf %193, %195 : vector<8x32xf32>
    %cst_31 = arith.constant dense<0.000000e+00> : vector<8x96xf32>
    %197 = tpu.matmul %196, %176, %cst_31 {dimension_numbers = #tpu.dot_dimension_numbers<[1], [0], [0], [1], [0, 0, 1, 1], [], []>} : vector<8x32xf32>, vector<32x96xf32>, vector<8x96xf32> -> vector<8x96xf32>
    %198 = arith.addf %197, %177 : vector<8x96xf32>
    %199 = arith.addf %175, %198 : vector<8x96xf32>
    %200 = vector.extract_strided_slice %199 {offsets = [0, 0], sizes = [8, 64], strides = [1, 1]} : vector<8x96xf32> to vector<8x64xf32>
    %201 = arith.negf %200 : vector<8x64xf32>
    %202 = math.exp %201 : vector<8x64xf32>
    %cst_32 = arith.constant 1.000000e+00 : f32
    %203 = vector.broadcast %cst_32 : f32 to vector<8x64xf32>
    %204 = arith.addf %203, %202 : vector<8x64xf32>
    %205 = arith.divf %203, %204 : vector<8x64xf32>
    %206 = vector.extract_strided_slice %205 {offsets = [0, 0], sizes = [8, 32], strides = [1, 1]} : vector<8x64xf32> to vector<8x32xf32>
    %207 = vector.extract_strided_slice %205 {offsets = [0, 32], sizes = [8, 32], strides = [1, 1]} : vector<8x64xf32> to vector<8x32xf32>
    %208 = vector.extract_strided_slice %175 {offsets = [0, 64], sizes = [8, 32], strides = [1, 1]} : vector<8x96xf32> to vector<8x32xf32>
    %209 = vector.extract_strided_slice %198 {offsets = [0, 64], sizes = [8, 32], strides = [1, 1]} : vector<8x96xf32> to vector<8x32xf32>
    %210 = arith.mulf %206, %209 : vector<8x32xf32>
    %211 = arith.addf %208, %210 : vector<8x32xf32>
    %212 = math.tanh %211 : vector<8x32xf32>
    %213 = arith.subf %196, %212 : vector<8x32xf32>
    %214 = arith.mulf %207, %213 : vector<8x32xf32>
    %215 = arith.addf %212, %214 : vector<8x32xf32>
    %cst_33 = arith.constant dense<0.000000e+00> : vector<8x96xf32>
    %216 = tpu.matmul %215, %176, %cst_33 {dimension_numbers = #tpu.dot_dimension_numbers<[1], [0], [0], [1], [0, 0, 1, 1], [], []>} : vector<8x32xf32>, vector<32x96xf32>, vector<8x96xf32> -> vector<8x96xf32>
    %217 = arith.addf %216, %177 : vector<8x96xf32>
    %218 = arith.addf %175, %217 : vector<8x96xf32>
    %219 = vector.extract_strided_slice %218 {offsets = [0, 0], sizes = [8, 64], strides = [1, 1]} : vector<8x96xf32> to vector<8x64xf32>
    %220 = arith.negf %219 : vector<8x64xf32>
    %221 = math.exp %220 : vector<8x64xf32>
    %cst_34 = arith.constant 1.000000e+00 : f32
    %222 = vector.broadcast %cst_34 : f32 to vector<8x64xf32>
    %223 = arith.addf %222, %221 : vector<8x64xf32>
    %224 = arith.divf %222, %223 : vector<8x64xf32>
    %225 = vector.extract_strided_slice %224 {offsets = [0, 0], sizes = [8, 32], strides = [1, 1]} : vector<8x64xf32> to vector<8x32xf32>
    %226 = vector.extract_strided_slice %224 {offsets = [0, 32], sizes = [8, 32], strides = [1, 1]} : vector<8x64xf32> to vector<8x32xf32>
    %227 = vector.extract_strided_slice %175 {offsets = [0, 64], sizes = [8, 32], strides = [1, 1]} : vector<8x96xf32> to vector<8x32xf32>
    %228 = vector.extract_strided_slice %217 {offsets = [0, 64], sizes = [8, 32], strides = [1, 1]} : vector<8x96xf32> to vector<8x32xf32>
    %229 = arith.mulf %225, %228 : vector<8x32xf32>
    %230 = arith.addf %227, %229 : vector<8x32xf32>
    %231 = math.tanh %230 : vector<8x32xf32>
    %232 = arith.subf %215, %231 : vector<8x32xf32>
    %233 = arith.mulf %226, %232 : vector<8x32xf32>
    %234 = arith.addf %231, %233 : vector<8x32xf32>
    %cst_35 = arith.constant dense<0.000000e+00> : vector<8x96xf32>
    %235 = tpu.matmul %234, %176, %cst_35 {dimension_numbers = #tpu.dot_dimension_numbers<[1], [0], [0], [1], [0, 0, 1, 1], [], []>} : vector<8x32xf32>, vector<32x96xf32>, vector<8x96xf32> -> vector<8x96xf32>
    %236 = arith.addf %235, %177 : vector<8x96xf32>
    %237 = arith.addf %175, %236 : vector<8x96xf32>
    %238 = vector.extract_strided_slice %237 {offsets = [0, 0], sizes = [8, 64], strides = [1, 1]} : vector<8x96xf32> to vector<8x64xf32>
    %239 = arith.negf %238 : vector<8x64xf32>
    %240 = math.exp %239 : vector<8x64xf32>
    %cst_36 = arith.constant 1.000000e+00 : f32
    %241 = vector.broadcast %cst_36 : f32 to vector<8x64xf32>
    %242 = arith.addf %241, %240 : vector<8x64xf32>
    %243 = arith.divf %241, %242 : vector<8x64xf32>
    %244 = vector.extract_strided_slice %243 {offsets = [0, 0], sizes = [8, 32], strides = [1, 1]} : vector<8x64xf32> to vector<8x32xf32>
    %245 = vector.extract_strided_slice %243 {offsets = [0, 32], sizes = [8, 32], strides = [1, 1]} : vector<8x64xf32> to vector<8x32xf32>
    %246 = vector.extract_strided_slice %175 {offsets = [0, 64], sizes = [8, 32], strides = [1, 1]} : vector<8x96xf32> to vector<8x32xf32>
    %247 = vector.extract_strided_slice %236 {offsets = [0, 64], sizes = [8, 32], strides = [1, 1]} : vector<8x96xf32> to vector<8x32xf32>
    %248 = arith.mulf %244, %247 : vector<8x32xf32>
    %249 = arith.addf %246, %248 : vector<8x32xf32>
    %250 = math.tanh %249 : vector<8x32xf32>
    %251 = arith.subf %234, %250 : vector<8x32xf32>
    %252 = arith.mulf %245, %251 : vector<8x32xf32>
    %253 = arith.addf %250, %252 : vector<8x32xf32>
    %254 = tpu.concatenate %196, %215, %234, %253 in 0 : vector<8x32xf32>, vector<8x32xf32>, vector<8x32xf32>, vector<8x32xf32> -> vector<32x32xf32>
    %c200 = arith.constant 200 : index
    %c0_37 = arith.constant 0 : index
    %255 = vector.load %arg0[%c200, %c0_37] : memref<296x128xf32, #tpu.memory_space<vmem>>, vector<32x2xf32>
    %cst_38 = arith.constant dense<0.000000e+00> : vector<32x2xf32>
    %256 = tpu.matmul %254, %255, %cst_38 {dimension_numbers = #tpu.dot_dimension_numbers<[1], [0], [0], [1], [0, 0, 1, 1], [], []>} : vector<32x32xf32>, vector<32x2xf32>, vector<32x2xf32> -> vector<32x2xf32>
    %257 = tpu.concatenate %3, %256 in 0 : vector<16x2xf32>, vector<32x2xf32> -> vector<48x2xf32>
    %c232 = arith.constant 232 : index
    %c0_39 = arith.constant 0 : index
    %258 = vector.load %arg0[%c232, %c0_39] : memref<296x128xf32, #tpu.memory_space<vmem>>, vector<32x48xf32>
    %cst_40 = arith.constant dense<0.000000e+00> : vector<32x2xf32>
    %259 = tpu.matmul %258, %257, %cst_40 {dimension_numbers = #tpu.dot_dimension_numbers<[1], [0], [0], [1], [0, 0, 1, 1], [], []>} : vector<32x48xf32>, vector<48x2xf32>, vector<32x2xf32> -> vector<32x2xf32>
    %c264 = arith.constant 264 : index
    %c0_41 = arith.constant 0 : index
    %260 = vector.load %arg0[%c264, %c0_41] : memref<296x128xf32, #tpu.memory_space<vmem>>, vector<32x2xf32>
    %261 = arith.addf %259, %260 : vector<32x2xf32>
    %c0_42 = arith.constant 0 : index
    %c0_43 = arith.constant 0 : index
    %262 = vector.load %arg2[%c0_42, %c0_43] : memref<32x2xf32, #tpu.memory_space<vmem>>, vector<32x2xf32>
    tpu.vector_store %arg2[%c0_42, %c0_43], %261 {strides = array<i32>} : memref<32x2xf32, #tpu.memory_space<vmem>>, vector<32x2xf32>,
    return
  }
}

</mosaic_0001>

<bundles_post_ra>
// kernel: timeseries_forward_pallas.1
= control target key start
LH: loop header
LB: loop body
LE: loop exit
PB: predicated region body
PF: predicated region fallthrough
CT: control target
= control target key end

     0   :  { %7 = vsyncpa [#allocation3], 0  ;;  %s2537_s9 = smov [#allocation2]   ;;  %s2870_s0 = inlined_call_operand.hbm [shape: f32[296,128], index: 0, kind: input, shape index: {}]   ;;  %s2871_s1 = inlined_call_operand.vmem [shape: f32[64,8], index: 1, kind: input, shape index: {}]   ;;  %s2872_s2 = inlined_call_operand.vmem [shape: f32[32,2], index: 2, kind: output, shape index: {}]  }
   0x1   :  { %s13_s10 = sshll.u32 %s2537_s9, 4  ;;  %s2513_s13 = scalar_lea.hbm %s2870_s0, 4736  ;;  %s14_s10 = int_to_ptr.vmem [resolvable:$true] %s13_s10 }
   0x2   :  { %p2514_p0 = scmp.ne.s32.totalorder %s2870_s0, %s2513_s13  ;;  %p2517_p1 = scmp.lt.u32.totalorder %s2513_s13, %s2870_s0 }
   0x4   :  { %p2519_p2 = pnand %p2517_p1, %p2514_p0 }
   0x6   :  { %2522 = shalt.err (!%p2519_p2)
}
   0x7   :  { %s2523_s18 = scalar_lea.vmem %s14_s10, 4736  ;;  %p2528_p4 = scmp.lt.s32.totalorder %s14_s10, %s14_s10 }
   0x8   :  { %p2524_p3 = scmp.ne.s32.totalorder %s14_s10, %s2523_s18  ;;  %p2529_p5 = scmp.lt.s32.totalorder %s2523_s18, %s2523_s18 }
   0xa   :  { %p2530_p6 = por %p2529_p5, %p2528_p4 }
   0xc   :  { %p2531_p7 = pnand %p2530_p6, %p2524_p3 }
   0xe   :  { %2534 = shalt.err (!%p2531_p7)
}
   0xf   :  { %s2538_s19 = smov 128   ;;  %s2539_s20 = smov 8  }
  0x10   :  { %19 = dma.hbm_to_vmem [thread:$0]  %s2870_s0, 4736, %s14_s10, [#allocation3], %s2538_s19, %s2538_s19, %s2539_s20  }
  0x11   :  { %2535 = dma.done.wait [#allocation3], 4736  }
  0x12   :  { %2536 = vsyncadd [#allocation3], 4294962560  ;;  %v2540_v0 = vmov 0.0|0.0   ;;  %vm2541_vm0 = vmmov 0   ;;  %v2542_v1 = vmov 0.0   ;;  %v34_v2 = vld [vmem:[%s2871_s1] sm:$0xff] }
  0x13   :  { %2293 = vmatprep.subr.bf16.mxu0 %v2540_v0  ;;  %2077 = vmatprep.mubr.msk.f32.mxu0 %vm2541_vm0, %v2542_v1  ;;  %v35_v3 = vld [vmem:[%s2871_s1 + $0x8] sm:$0xff]  ;;  %v36_v4 = vld [vmem:[%s2871_s1 + $0x10] sm:$0xff]  ;;  %v37_v6 = vld [vmem:[%s2871_s1 + $0x18] sm:$0xff]  ;;  %vm42_vm1 = vcmask 523264   ;;  %vm181_vm2 = vcmask 64512   ;;  %s2544_s10 = smov 96  }
  0x14   :  { %v2294_v5 = vpack.c.bf16 %v35_v3, %v34_v2  ;;  %v2297_v7 = vpack.c.bf16 %v37_v6, %v36_v4  ;;  %v38_v8 = vld [vmem:[%s2871_s1 + $0x20] sm:$0xff]  ;;  %v39_v9 = vld [vmem:[%s2871_s1 + $0x28] sm:$0xff]  ;;  %v40_v11 = vld [vmem:[%s2871_s1 + $0x30] sm:$0xff]  ;;  %s2545_s11 = smov 32   ;;  %vm316_vm3 = vcmask 261120   ;;  %s2546_s12 = smov 1  }
  0x15   :  { %v2300_v10 = vpack.c.bf16 %v39_v9, %v38_v8  ;;  %v41_v12 = vld [vmem:[%s2871_s1 + $0x38] sm:$0xff]  ;;  %v25_v14 = vld [vmem:[#allocation2] sm:$0xff]  ;;  %v26_v15 = vld [vmem:[#allocation2 + $0x8] sm:$0xff]  ;;  %s2543_s1 = smov 64   ;;  %s2547_s13 = smov 127   ;;  %vm1795_vm4 = vcmask 392192  }
  0x16   :  { %2295 = vmatpush3.bf16.msra.mxu0 %v2294_v5  ;;  %v2303_v13 = vpack.c.bf16 %v41_v12, %v40_v11  ;;  %v27_v16 = vld [vmem:[#allocation2 + $0x10] sm:$0xff]  ;;  %v28_v17 = vld [vmem:[#allocation2 + $0x18] sm:$0xff]  ;;  %v29_v18 = vld [vmem:[#allocation2 + $0x20] sm:$0xff]  ;;  %vm1893_vm5 = vcmask 15360  }
  0x17   :  { %2296 = vmatprep.subr.bf16.mxu0 %v2540_v0  ;;  %v30_v19 = vld [vmem:[#allocation2 + $0x28] sm:$0xff]  ;;  %v31_v20 = vld [vmem:[#allocation2 + $0x30] sm:$0xff]  ;;  %v32_v21 = vld [vmem:[#allocation2 + $0x38] sm:$0xff] }
  0x18   :  { %v33_v22 = vld [vmem:[#allocation2 + $0x40] sm:$0xff]  ;;  %v180_v23 = vld [vmem:[#allocation2 + $0x48] sm:$0xff]  ;;  %v311_v26 = vld [vmem:[#allocation2 + $0x50] sm:$0xff] }
  0x19   :  { %2403 = vmatprep.subr.mxu1 %v180_v23  ;;  %v312_v27 = vld [vmem:[#allocation2 + $0x58] sm:$0xff]  ;;  %v313_v31 = vld [vmem:[#allocation2 + $0x60] sm:$0xff]  ;;  %v314_v32 = vld [vmem:[#allocation2 + $0x68] sm:$0xff] }
  0x1a   :  { %2298 = vmatpush3.bf16.msra.mxu0 %v2297_v7  ;;  %2404 = vmatpush3.msra.mxu1 %v180_v23  ;;  %v2633_v29 = vpack.c.bf16 %v312_v27, %v311_v26  ;;  %v2638_v34 = vpack.c.bf16 %v314_v32, %v313_v31  ;;  %v2682_v57 = vld [vmem:[#allocation2 + $0x70] sm:$0xff] }
  0x1b   :  { %2299 = vmatprep.subr.bf16.mxu0 %v2540_v0  ;;  %2305 = vmatprep.subr.bf16.mxu1 %v2540_v0 }
  0x1e   :  { %2301 = vmatpush3.bf16.msra.mxu0 %v2300_v10 }
  0x1f   :  { %2302 = vmatprep.subr.bf16.mxu0 %v2540_v0 }
  0x22   :  { %2304 = vmatpush3.bf16.msra.mxu0 %v2303_v13 }
  0x23   :  { %2104 = vmatprep.subr.mxu0 %v180_v23 }
  0x25   :  { %2078 = vmatmul.mubr.msk.f32.vlgmr.msra.gmra.mrb[0].mxu0 %vm42_vm1, %v25_v14 }
  0x26   :  { %2080 = vmatprep.mubr.msk.f32.mxu0 %vm2541_vm0, %v2542_v1  ;;  %2105 = vmatpush3.msra.mxu0 %v180_v23 }
  0x27   :  { %2335 = vmatprep.subr.bf16.mxu0 %v2540_v0 }
  0x29   :  { %2081 = vmatmul.mubr.msk.f32.gmra.mrb[2].mxu0 %vm42_vm1, %v26_v15 }
  0x2a   :  { %2083 = vmatprep.mubr.msk.f32.mxu0 %vm2541_vm0, %v2542_v1 }
  0x2d   :  { %2084 = vmatmul.mubr.msk.f32.gmra.mrb[4].mxu0 %vm42_vm1, %v27_v16 }
  0x2e   :  { %2086 = vmatprep.mubr.msk.f32.mxu0 %vm2541_vm0, %v2542_v1 }
  0x31   :  { %2087 = vmatmul.mubr.msk.f32.gmra.mrb[6].mxu0 %vm42_vm1, %v28_v17 }
  0x32   :  { %2089 = vmatprep.mubr.msk.f32.mxu0 %vm2541_vm0, %v2542_v1 }
  0x35   :  { %2090 = vmatmul.mubr.msk.f32.gmra.mrb[8].mxu0 %vm42_vm1, %v29_v18 }
  0x36   :  { %2092 = vmatprep.mubr.msk.f32.mxu0 %vm2541_vm0, %v2542_v1 }
  0x39   :  { %2093 = vmatmul.mubr.msk.f32.gmra.mrb[10].mxu0 %vm42_vm1, %v30_v19 }
  0x3a   :  { %2095 = vmatprep.mubr.msk.f32.mxu0 %vm2541_vm0, %v2542_v1 }
  0x3d   :  { %2096 = vmatmul.mubr.msk.f32.gmra.mrb[12].mxu0 %vm42_vm1, %v31_v20 }
  0x3e   :  { %2098 = vmatprep.mubr.msk.f32.mxu0 %vm2541_vm0, %v2542_v1 }
  0x41   :  { %2099 = vmatmul.mubr.msk.f32.gmra.mrb[14].mxu0 %vm42_vm1, %v32_v21 }
  0x42   :  { %2101 = vmatprep.mubr.msk.f32.mxu0 %vm2541_vm0, %v2542_v1 }
  0x45   :  { %2102 = vmatmul.mubr.msk.f32.gmra.mrb[16].mxu0 %vm42_vm1, %v33_v22 }
  0xf8   :  { %v136_v24 = vpop.f32.mrb[0].mxu0 }
  0xf9   :  { %v2079_v25 = vpop.f32.mrb[1].mxu0  ;;  %2106 = vmatprep.mubr.msk.f32.mxu0 %vm181_vm2, %v136_v24 }
  0xfc   :  { %v141_v28 = vpop.f32.mrb[2].mxu0 }
  0xfd   :  { %v2082_v30 = vpop.f32.mrb[3].mxu0  ;;  %2107 = vmatmul.mubr.msk.f32.vlgmr.msra.gmra.mrb[18].mxu0 %vm181_vm2, %v141_v28 }
  0xfe   :  { %2337 = vmatpush3.bf16.msra.mxu0 %v2633_v29 }
  0xff   :  { %2338 = vmatprep.subr.bf16.mxu0 %v2540_v0 }
 0x100   :  { %v146_v33 = vpop.f32.mrb[4].mxu0 }
 0x101   :  { %v2085_v35 = vpop.f32.mrb[5].mxu0  ;;  %2109 = vmatprep.mubr.msk.f32.mxu0 %vm181_vm2, %v146_v33 }
 0x102   :  { %2340 = vmatpush3.bf16.msra.mxu0 %v2638_v34 }
 0x103   :  { %2347 = vmatprep.subr.bf16.mxu0 %v2540_v0 }
 0x104   :  { %v151_v36 = vpop.f32.mrb[6].mxu0 }
 0x105   :  { %v2088_v37 = vpop.f32.mrb[7].mxu0  ;;  %2110 = vmatmul.mubr.msk.f32.gmra.mrb[20].mxu0 %vm181_vm2, %v151_v36 }
 0x106   :  { %2181 = vmatprep.mubr.msk.f32.mxu0 %vm2541_vm0, %v2542_v1 }
 0x108   :  { %v156_v38 = vpop.f32.mrb[8].mxu0 }
 0x109   :  { %v2091_v39 = vpop.f32.mrb[9].mxu0  ;;  %2112 = vmatprep.mubr.msk.f32.mxu1 %vm181_vm2, %v156_v38 }
 0x10c   :  { %v161_v40 = vpop.f32.mrb[10].mxu0 }
 0x10d   :  { %v2094_v41 = vpop.f32.mrb[11].mxu0  ;;  %2113 = vmatmul.mubr.msk.f32.vlgmr.msra.gmra.mrb[0].mxu1 %vm181_vm2, %v161_v40 }
 0x10e   :  { %2307 = vmatpush3.bf16.msra.mxu1 %v2633_v29 }
 0x10f   :  { %2308 = vmatprep.subr.bf16.mxu1 %v2540_v0 }
 0x110   :  { %v166_v42 = vpop.f32.mrb[12].mxu0 }
 0x111   :  { %v2097_v43 = vpop.f32.mrb[13].mxu0  ;;  %2115 = vmatprep.mubr.msk.f32.mxu1 %vm181_vm2, %v166_v42 }
 0x112   :  { %2310 = vmatpush3.bf16.msra.mxu1 %v2638_v34 }
 0x113   :  { %2311 = vmatprep.subr.bf16.mxu1 %v2540_v0 }
 0x114   :  { %v2653_v44 = vpop.f32.mrb[14].mxu0 }
 0x115   :  { %v2100_v45 = vpop.f32.mrb[15].mxu0  ;;  %2116 = vmatmul.mubr.msk.f32.gmra.mrb[2].mxu1 %vm181_vm2, %v2653_v44 }
 0x116   :  { %2126 = vmatprep.mubr.msk.f32.mxu1 %vm2541_vm0, %v2542_v1 }
 0x118   :  { %v2659_v46 = vpop.f32.mrb[16].mxu0 }
 0x119   :  { %v2426_v47 = vpack.i.bf16 %v2659_v46, %v2653_v44  ;;  %2127 = vmatmul.mubr.f32.vlgmr.msra.gmra.mrb[4].mxu1 %v2542_v1  ;;  %v2103_v48 = vpop.f32.mrb[17].mxu0  ;;  %v1768_v44 = vld [vmem:[#allocation2 + $0xe8] sm:$0xff] }
 0x11a   :  { %2313 = vmatpush3.bf16.msra.mxu1 %v2633_v29  ;;  %2137 = vmatprep.mubr.msk.f32.mxu1 %vm2541_vm0, %v2542_v1 }
 0x11b   :  { %2314 = vmatprep.subr.bf16.mxu1 %v2540_v0 }
 0x11e   :  { %2316 = vmatpush3.bf16.msra.mxu1 %v2638_v34 }
 0x11f   :  { %2317 = vmatprep.subr.bf16.mxu1 %v2540_v0 }
 0x1d0   :  { %v2108_v49 = vpop.f32.mrb[18].mxu0 }
 0x1d1   :  { %v272_v50 = vpop.f32.mrb[19].mxu0 }
 0x1d8   :  { %v2670_v51 = vpop.f32.mrb[20].mxu0 }
 0x1d9   :  { %v2672_v52 = vpop.f32.mrb[21].mxu0 }
 0x1e0   :  { %v2674_v53 = vpop.f32.mrb[0].mxu1 }
 0x1e1   :  { %v2676_v54 = vpop.f32.mrb[1].mxu1 }
 0x1e8   :  { %v2678_v55 = vpop.f32.mrb[2].mxu1 }
 0x1e9   :  { %v2680_v56 = vpop.f32.mrb[3].mxu1 }
 0x1ec   :  { %v386_v58 = vpop.f32.mrb[4].mxu1 }
 0x1ed   :  { %v387_v59 = vadd.f32 %v386_v58, %v2682_v57  ;;  %v2128_v60 = vpop.f32.mrb[5].mxu1 }
 0x1ef   :  { %v390_v61 = vadd.f32 %v387_v59, %v272_v50  ;;  %398 = vrot.lane.b32.xlu0 %v387_v59, %s2543_s1 }
 0x1f1   :  { %v1920_v62 = vmul.f32 -1.442695, %v390_v61 }
 0x1f3   :  { %2441 = vpow2.f32 %v1920_v62 }
 0x1fd   :  { %v2442_v63 = vpop.eup %2441 }
 0x1fe   :  { %v394_v2 = vadd.f32 1.0, %v2442_v63 }
 0x200   :  { %2443 = vrcp.f32 %v394_v2 }
 0x20a   :  { %v2444_v3 = vpop.eup %2443 }
 0x261   :  { %v399_v4 = vpop.permute.xlu0 %398 }
 0x262   :  { %v401_v5 = vmul.f32 %v2444_v3, %v399_v4 }
 0x264   :  { %403 = vrot.lane.b32.xlu0 %v401_v5, %s2543_s1 }
 0x2d6   :  { %v404_v6 = vpop.permute.xlu0 %403 }
 0x2d7   :  { %v406_v7 = vadd.f32 %v404_v6, %v272_v50 }
 0x2d9   :  { %2445 = vtanh.f32 %v406_v7 }
 0x2e3   :  { %v2446_v8 = vpop.eup %2445 }
 0x2e4   :  { %v408_v9 = vsub.f32 0.0, %v2446_v8 }
 0x2e6   :  { %410 = vrot.lane.b32.xlu1 %v408_v9, %s2544_s10 }
 0x358   :  { %v411_v10 = vpop.permute.xlu1 %410 }
 0x359   :  { %v413_v11 = vmul.f32 %v2444_v3, %v411_v10 }
 0x35b   :  { %415 = vrot.lane.b32.xlu1 %v413_v11, %s2545_s11 }
 0x3cd   :  { %v416_v12 = vpop.permute.xlu1 %415 }
 0x3ce   :  { %v418_v13 = vadd.f32 %v2446_v8, %v416_v12 }
 0x3d0   :  { %420 = vrot.lane.b32.xlu0 %v418_v13, %s2543_s1 }
 0x442   :  { %v421_v14 = vpop.permute.xlu0 %420 }
 0x443   :  { %2138 = vmatmul.mubr.msk.f32.vlgmr.msra.gmra.mrb[6].mxu1 %vm316_vm3, %v421_v14 }
 0x444   :  { %2319 = vmatpush3.bf16.msra.mxu1 %v2633_v29  ;;  %2148 = vmatprep.mubr.msk.f32.mxu1 %vm2541_vm0, %v2542_v1 }
 0x445   :  { %2320 = vmatprep.subr.bf16.mxu1 %v2540_v0 }
 0x448   :  { %2322 = vmatpush3.bf16.msra.mxu1 %v2638_v34 }
 0x449   :  { %2323 = vmatprep.subr.bf16.mxu1 %v2540_v0 }
 0x516   :  { %v490_v15 = vpop.f32.mrb[6].mxu1 }
 0x517   :  { %v491_v16 = vadd.f32 %v490_v15, %v2682_v57  ;;  %v2139_v17 = vpop.f32.mrb[7].mxu1 }
 0x519   :  { %v494_v18 = vadd.f32 %v2108_v49, %v491_v16  ;;  %502 = vrot.lane.b32.xlu1 %v491_v16, %s2543_s1 }
 0x51b   :  { %v1922_v19 = vmul.f32 -1.442695, %v494_v18 }
 0x51d   :  { %2447 = vpow2.f32 %v1922_v19 }
 0x527   :  { %v2448_v20 = vpop.eup %2447 }
 0x528   :  { %v498_v21 = vadd.f32 1.0, %v2448_v20 }
 0x52a   :  { %2449 = vrcp.f32 %v498_v21 }
 0x534   :  { %v2450_v22 = vpop.eup %2449 }
 0x58b   :  { %v503_v23 = vpop.permute.xlu1 %502 }
 0x58c   :  { %v505_v24 = vmul.f32 %v2450_v22, %v503_v23 }
 0x58e   :  { %507 = vrot.lane.b32.xlu0 %v505_v24, %s2543_s1 }
 0x600   :  { %v508_v25 = vpop.permute.xlu0 %507 }
 0x601   :  { %v510_v26 = vadd.f32 %v2108_v49, %v508_v25 }
 0x603   :  { %2451 = vtanh.f32 %v510_v26 }
 0x60d   :  { %v2452_v27 = vpop.eup %2451 }
 0x60e   :  { %v512_v28 = vsub.f32 %v418_v13, %v2452_v27 }
 0x610   :  { %514 = vrot.lane.b32.xlu1 %v512_v28, %s2544_s10 }
 0x682   :  { %v515_v30 = vpop.permute.xlu1 %514 }
 0x683   :  { %v517_v31 = vmul.f32 %v2450_v22, %v515_v30 }
 0x685   :  { %519 = vrot.lane.b32.xlu0 %v517_v31, %s2545_s11 }
 0x6f7   :  { %v520_v32 = vpop.permute.xlu0 %519 }
 0x6f8   :  { %v522_v33 = vadd.f32 %v2452_v27, %v520_v32 }
 0x6fa   :  { %524 = vrot.lane.b32.xlu1 %v522_v33, %s2543_s1 }
 0x76c   :  { %v525_v35 = vpop.permute.xlu1 %524 }
 0x76d   :  { %2149 = vmatmul.mubr.msk.f32.vlgmr.msra.gmra.mrb[8].mxu1 %vm316_vm3, %v525_v35 }
 0x76e   :  { %2325 = vmatpush3.bf16.msra.mxu1 %v2633_v29  ;;  %2159 = vmatprep.mubr.msk.f32.mxu1 %vm2541_vm0, %v2542_v1 }
 0x76f   :  { %2326 = vmatprep.subr.bf16.mxu1 %v2540_v0 }
 0x772   :  { %2328 = vmatpush3.bf16.msra.mxu1 %v2638_v34 }
 0x773   :  { %2329 = vmatprep.subr.bf16.mxu1 %v2540_v0 }
 0x840   :  { %v594_v36 = vpop.f32.mrb[8].mxu1 }
 0x841   :  { %v595_v37 = vadd.f32 %v594_v36, %v2682_v57  ;;  %v2150_v38 = vpop.f32.mrb[9].mxu1 }
 0x843   :  { %v598_v39 = vadd.f32 %v595_v37, %v2672_v52  ;;  %606 = vrot.lane.b32.xlu0 %v595_v37, %s2543_s1 }
 0x845   :  { %v1924_v40 = vmul.f32 -1.442695, %v598_v39 }
 0x847   :  { %2453 = vpow2.f32 %v1924_v40 }
 0x851   :  { %v2454_v41 = vpop.eup %2453 }
 0x852   :  { %v602_v42 = vadd.f32 1.0, %v2454_v41 }
 0x854   :  { %2455 = vrcp.f32 %v602_v42 }
 0x85e   :  { %v2456_v43 = vpop.eup %2455 }
 0x8b5   :  { %v607_v45 = vpop.permute.xlu0 %606 }
 0x8b6   :  { %v609_v48 = vmul.f32 %v2456_v43, %v607_v45 }
 0x8b8   :  { %611 = vrot.lane.b32.xlu1 %v609_v48, %s2543_s1 }
 0x92a   :  { %v612_v49 = vpop.permute.xlu1 %611 }
 0x92b   :  { %v614_v50 = vadd.f32 %v612_v49, %v2672_v52 }
 0x92d   :  { %2457 = vtanh.f32 %v614_v50 }
 0x937   :  { %v2458_v58 = vpop.eup %2457 }
 0x938   :  { %v616_v59 = vsub.f32 %v522_v33, %v2458_v58 }
 0x93a   :  { %618 = vrot.lane.b32.xlu0 %v616_v59, %s2544_s10 }
 0x9ac   :  { %v619_v60 = vpop.permute.xlu0 %618 }
 0x9ad   :  { %v621_v61 = vmul.f32 %v2456_v43, %v619_v60 }
 0x9af   :  { %623 = vrot.lane.b32.xlu1 %v621_v61, %s2545_s11 }
 0xa21   :  { %v624_v62 = vpop.permute.xlu1 %623 }
 0xa22   :  { %v626_v63 = vadd.f32 %v2458_v58, %v624_v62 }
 0xa24   :  { %628 = vrot.lane.b32.xlu0 %v626_v63, %s2543_s1 }
 0xa96   :  { %v629_v2 = vpop.permute.xlu0 %628 }
 0xa97   :  { %2160 = vmatmul.mubr.msk.f32.vlgmr.msra.gmra.mrb[10].mxu1 %vm316_vm3, %v629_v2 }
 0xa98   :  { %2331 = vmatpush3.bf16.msra.mxu1 %v2633_v29  ;;  %2170 = vmatprep.mubr.msk.f32.mxu1 %vm2541_vm0, %v2542_v1 }
 0xa99   :  { %2332 = vmatprep.subr.bf16.mxu1 %v2540_v0 }
 0xa9c   :  { %2334 = vmatpush3.bf16.msra.mxu1 %v2638_v34 }
 0xa9d   :  { %2341 = vmatprep.subr.bf16.mxu1 %v2540_v0 }
 0xb6a   :  { %v698_v52 = vpop.f32.mrb[10].mxu1 }
 0xb6b   :  { %v699_v3 = vadd.f32 %v698_v52, %v2682_v57  ;;  %v2161_v4 = vpop.f32.mrb[11].mxu1 }
 0xb6d   :  { %v702_v5 = vadd.f32 %v2670_v51, %v699_v3  ;;  %710 = vrot.lane.b32.xlu1 %v699_v3, %s2543_s1 }
 0xb6f   :  { %v1926_v6 = vmul.f32 -1.442695, %v702_v5 }
 0xb71   :  { %2459 = vpow2.f32 %v1926_v6 }
 0xb7b   :  { %v2460_v7 = vpop.eup %2459 }
 0xb7c   :  { %v706_v8 = vadd.f32 1.0, %v2460_v7 }
 0xb7e   :  { %2461 = vrcp.f32 %v706_v8 }
 0xb88   :  { %v2462_v9 = vpop.eup %2461 }
 0xbdf   :  { %v711_v10 = vpop.permute.xlu1 %710 }
 0xbe0   :  { %v713_v11 = vmul.f32 %v2462_v9, %v711_v10 }
 0xbe2   :  { %715 = vrot.lane.b32.xlu0 %v713_v11, %s2543_s1 }
 0xc54   :  { %v716_v12 = vpop.permute.xlu0 %715 }
 0xc55   :  { %v718_v13 = vadd.f32 %v2670_v51, %v716_v12 }
 0xc57   :  { %2463 = vtanh.f32 %v718_v13 }
 0xc61   :  { %v2464_v14 = vpop.eup %2463 }
 0xc62   :  { %v720_v15 = vsub.f32 %v626_v63, %v2464_v14 }
 0xc64   :  { %722 = vrot.lane.b32.xlu1 %v720_v15, %s2544_s10 }
 0xcd6   :  { %v723_v16 = vpop.permute.xlu1 %722 }
 0xcd7   :  { %v725_v17 = vmul.f32 %v2462_v9, %v723_v16 }
 0xcd9   :  { %727 = vrot.lane.b32.xlu0 %v725_v17, %s2545_s11 }
 0xd4b   :  { %v728_v18 = vpop.permute.xlu0 %727 }
 0xd4c   :  { %v730_v19 = vadd.f32 %v2464_v14, %v728_v18 }
 0xd4e   :  { %732 = vrot.lane.b32.xlu1 %v730_v19, %s2543_s1 }
 0xdc0   :  { %v733_v20 = vpop.permute.xlu1 %732 }
 0xdc1   :  { %2171 = vmatmul.mubr.msk.f32.vlgmr.msra.gmra.mrb[12].mxu1 %vm316_vm3, %v733_v20 }
 0xdc2   :  { %2343 = vmatpush3.bf16.msra.mxu1 %v2633_v29  ;;  %2192 = vmatprep.mubr.msk.f32.mxu1 %vm2541_vm0, %v2542_v1 }
 0xdc3   :  { %2344 = vmatprep.subr.bf16.mxu1 %v2540_v0 }
 0xdc6   :  { %2346 = vmatpush3.bf16.msra.mxu1 %v2638_v34 }
 0xdc7   :  { %2353 = vmatprep.subr.bf16.mxu1 %v2540_v0 }
 0xe94   :  { %v802_v51 = vpop.f32.mrb[12].mxu1 }
 0xe95   :  { %v803_v21 = vadd.f32 %v802_v51, %v2682_v57  ;;  %v2172_v22 = vpop.f32.mrb[13].mxu1 }
 0xe97   :  { %v806_v23 = vadd.f32 %v803_v21, %v2676_v54  ;;  %814 = vrot.lane.b32.xlu0 %v803_v21, %s2543_s1 }
 0xe99   :  { %v1928_v24 = vmul.f32 -1.442695, %v806_v23 }
 0xe9b   :  { %2465 = vpow2.f32 %v1928_v24 }
 0xea5   :  { %v2466_v25 = vpop.eup %2465 }
 0xea6   :  { %v810_v26 = vadd.f32 1.0, %v2466_v25 }
 0xea8   :  { %2467 = vrcp.f32 %v810_v26 }
 0xeb2   :  { %v2468_v27 = vpop.eup %2467 }
 0xf09   :  { %v815_v28 = vpop.permute.xlu0 %814 }
 0xf0a   :  { %v817_v30 = vmul.f32 %v2468_v27, %v815_v28 }
 0xf0c   :  { %819 = vrot.lane.b32.xlu1 %v817_v30, %s2543_s1 }
 0xf7e   :  { %v820_v31 = vpop.permute.xlu1 %819 }
 0xf7f   :  { %v822_v32 = vadd.f32 %v820_v31, %v2676_v54 }
 0xf81   :  { %2469 = vtanh.f32 %v822_v32 }
 0xf8b   :  { %v2470_v33 = vpop.eup %2469 }
 0xf8c   :  { %v824_v35 = vsub.f32 %v730_v19, %v2470_v33 }
 0xf8e   :  { %826 = vrot.lane.b32.xlu0 %v824_v35, %s2544_s10  ;;  %v1147_v35 = vld [vmem:[#allocation2 + $0x78] sm:$0xff] }
0x1000   :  { %v827_v36 = vpop.permute.xlu0 %826 }
0x1001   :  { %v829_v37 = vmul.f32 %v2468_v27, %v827_v36  ;;  %v1148_v36 = vld [vmem:[#allocation2 + $0x80] sm:$0xff] }
0x1003   :  { %831 = vrot.lane.b32.xlu1 %v829_v37, %s2545_s11  ;;  %v1149_v37 = vld [vmem:[#allocation2 + $0x88] sm:$0xff] }
0x1075   :  { %v832_v38 = vpop.permute.xlu1 %831 }
0x1076   :  { %v834_v39 = vadd.f32 %v2470_v33, %v832_v38  ;;  %v2354_v38 = vpack.c.bf16 %v1148_v36, %v1147_v35 }
0x1078   :  { %836 = vrot.lane.b32.xlu0 %v834_v39, %s2543_s1 }
0x10ea   :  { %v837_v40 = vpop.permute.xlu0 %836 }
0x10eb   :  { %2182 = vmatmul.mubr.msk.f32.vlgmr.msra.gmra.mrb[22].mxu0 %vm316_vm3, %v837_v40 }
0x10ec   :  { %2349 = vmatpush3.bf16.msra.mxu0 %v2633_v29  ;;  %2203 = vmatprep.mubr.msk.f32.mxu0 %vm2541_vm0, %v2542_v1 }
0x10ed   :  { %2350 = vmatprep.subr.bf16.mxu0 %v2540_v0 }
0x10f0   :  { %2352 = vmatpush3.bf16.msra.mxu0 %v2638_v34 }
0x10f1   :  { %2359 = vmatprep.subr.bf16.mxu0 %v2540_v0 }
0x11be   :  { %v906_v54 = vpop.f32.mrb[22].mxu0 }
0x11bf   :  { %v907_v41 = vadd.f32 %v906_v54, %v2682_v57  ;;  %v2183_v42 = vpop.f32.mrb[23].mxu0 }
0x11c0   :  { %v1228_v42 = vld [vmem:[#allocation2 + $0xa8] sm:$0xff] }
0x11c1   :  { %v910_v43 = vadd.f32 %v2674_v53, %v907_v41  ;;  %918 = vrot.lane.b32.xlu1 %v907_v41, %s2543_s1 }
0x11c3   :  { %v1930_v45 = vmul.f32 -1.442695, %v910_v43 }
0x11c5   :  { %2471 = vpow2.f32 %v1930_v45 }
0x11cf   :  { %v2472_v29 = vpop.eup %2471 }
0x11d0   :  { %v914_v48 = vadd.f32 1.0, %v2472_v29 }
0x11d2   :  { %2473 = vrcp.f32 %v914_v48 }
0x11dc   :  { %v2474_v49 = vpop.eup %2473 }
0x1233   :  { %v919_v50 = vpop.permute.xlu1 %918 }
0x1234   :  { %v921_v58 = vmul.f32 %v2474_v49, %v919_v50  ;;  %v1230_v50 = vld [vmem:[#allocation2 + $0xb8] sm:$0xff] }
0x1236   :  { %923 = vrot.lane.b32.xlu0 %v921_v58, %s2543_s1 }
0x12a8   :  { %v924_v34 = vpop.permute.xlu0 %923 }
0x12a9   :  { %v926_v59 = vadd.f32 %v2674_v53, %v924_v34  ;;  %v1151_v34 = vld [vmem:[#allocation2 + $0x98] sm:$0xff] }
0x12ab   :  { %2475 = vtanh.f32 %v926_v59 }
0x12b5   :  { %v2476_v60 = vpop.eup %2475 }
0x12b6   :  { %v928_v61 = vsub.f32 %v834_v39, %v2476_v60  ;;  %v1150_v39 = vld [vmem:[#allocation2 + $0x90] sm:$0xff] }
0x12b7   :  { %v2357_v40 = vpack.c.bf16 %v1150_v39, %v1149_v37  ;;  %v1664_v39 = vld [vmem:[#allocation2 + $0xd8] sm:$0xff] }
0x12b8   :  { %930 = vrot.lane.b32.xlu1 %v928_v61, %s2544_s10 }
0x132a   :  { %v931_v62 = vpop.permute.xlu1 %930 }
0x132b   :  { %v933_v63 = vmul.f32 %v2474_v49, %v931_v62  ;;  %v1229_v49 = vld [vmem:[#allocation2 + $0xb0] sm:$0xff]  ;;  %v2801_v62 = vld [vmem:[#allocation2 + $0xc0] sm:$0xff] }
0x132c   :  { %v2363_v58 = vpack.c.bf16 %v1230_v50, %v1229_v49 }
0x132d   :  { %935 = vrot.lane.b32.xlu0 %v933_v63, %s2545_s11 }
0x139f   :  { %v936_v2 = vpop.permute.xlu0 %935 }
0x13a0   :  { %v938_v52 = vadd.f32 %v2476_v60, %v936_v2 }
0x13a2   :  { %940 = vrot.lane.b32.xlu1 %v938_v52, %s2543_s1 }
0x1414   :  { %v941_v3 = vpop.permute.xlu1 %940 }
0x1415   :  { %2193 = vmatmul.mubr.msk.f32.vlgmr.msra.gmra.mrb[14].mxu1 %vm316_vm3, %v941_v3 }
0x1416   :  { %2214 = vmatprep.mubr.msk.f32.mxu1 %vm2541_vm0, %v2542_v1  ;;  %2355 = vmatpush3.bf16.msra.mxu1 %v2354_v38 }
0x1417   :  { %2356 = vmatprep.subr.bf16.mxu1 %v2540_v0 }
0x141a   :  { %2358 = vmatpush3.bf16.msra.mxu1 %v2357_v40  ;;  %v1665_v40 = vld [vmem:[#allocation2 + $0xe0] sm:$0xff] }
0x141b   :  { %2365 = vmatprep.subr.bf16.mxu1 %v2540_v0 }
0x14e8   :  { %v1010_v53 = vpop.f32.mrb[14].mxu1 }
0x14e9   :  { %v1011_v4 = vadd.f32 %v1010_v53, %v2682_v57  ;;  %v2194_v5 = vpop.f32.mrb[15].mxu1 }
0x14eb   :  { %v1014_v6 = vadd.f32 %v1011_v4, %v2680_v56  ;;  %1022 = vrot.lane.b32.xlu0 %v1011_v4, %s2543_s1 }
0x14ed   :  { %v1932_v7 = vmul.f32 -1.442695, %v1014_v6 }
0x14ef   :  { %2477 = vpow2.f32 %v1932_v7 }
0x14f9   :  { %v2478_v8 = vpop.eup %2477 }
0x14fa   :  { %v1018_v9 = vadd.f32 1.0, %v2478_v8 }
0x14fc   :  { %2479 = vrcp.f32 %v1018_v9 }
0x1506   :  { %v2480_v10 = vpop.eup %2479 }
0x155d   :  { %v1023_v11 = vpop.permute.xlu0 %1022 }
0x155e   :  { %v1025_v12 = vmul.f32 %v2480_v10, %v1023_v11 }
0x1560   :  { %1027 = vrot.lane.b32.xlu1 %v1025_v12, %s2543_s1 }
0x15d2   :  { %v1028_v13 = vpop.permute.xlu1 %1027 }
0x15d3   :  { %v1030_v14 = vadd.f32 %v1028_v13, %v2680_v56 }
0x15d5   :  { %2481 = vtanh.f32 %v1030_v14 }
0x15df   :  { %v2482_v15 = vpop.eup %2481 }
0x15e0   :  { %v1032_v16 = vsub.f32 %v938_v52, %v2482_v15 }
0x15e2   :  { %1034 = vrot.lane.b32.xlu0 %v1032_v16, %s2544_s10 }
0x1654   :  { %v1035_v17 = vpop.permute.xlu0 %1034 }
0x1655   :  { %v1037_v18 = vmul.f32 %v2480_v10, %v1035_v17 }
0x1657   :  { %1039 = vrot.lane.b32.xlu1 %v1037_v18, %s2545_s11 }
0x16c9   :  { %v1040_v19 = vpop.permute.xlu1 %1039 }
0x16ca   :  { %v1042_v20 = vadd.f32 %v2482_v15, %v1040_v19 }
0x16cc   :  { %1044 = vrot.lane.b32.xlu0 %v1042_v20, %s2543_s1 }
0x173e   :  { %v1045_v51 = vpop.permute.xlu0 %1044 }
0x173f   :  { %2204 = vmatmul.mubr.msk.f32.vlgmr.msra.gmra.mrb[24].mxu0 %vm316_vm3, %v1045_v51 }
0x1740   :  { %2225 = vmatprep.mubr.msk.f32.mxu0 %vm2541_vm0, %v2542_v1 }
0x1812   :  { %v1114_v56 = vpop.f32.mrb[24].mxu0 }
0x1813   :  { %v1115_v21 = vadd.f32 %v1114_v56, %v2682_v57  ;;  %v2205_v22 = vpop.f32.mrb[25].mxu0 }
0x1815   :  { %v1118_v23 = vadd.f32 %v2678_v55, %v1115_v21  ;;  %1126 = vrot.lane.b32.xlu1 %v1115_v21, %s2543_s1 }
0x1817   :  { %v1934_v24 = vmul.f32 -1.442695, %v1118_v23 }
0x1819   :  { %2483 = vpow2.f32 %v1934_v24 }
0x1823   :  { %v2484_v25 = vpop.eup %2483 }
0x1824   :  { %v1122_v26 = vadd.f32 1.0, %v2484_v25 }
0x1826   :  { %2485 = vrcp.f32 %v1122_v26 }
0x1830   :  { %v2486_v27 = vpop.eup %2485 }
0x1887   :  { %v1127_v28 = vpop.permute.xlu1 %1126 }
0x1888   :  { %v1129_v30 = vmul.f32 %v2486_v27, %v1127_v28 }
0x188a   :  { %1131 = vrot.lane.b32.xlu0 %v1129_v30, %s2543_s1 }
0x18fc   :  { %v1132_v31 = vpop.permute.xlu0 %1131 }
0x18fd   :  { %v1134_v32 = vadd.f32 %v2678_v55, %v1132_v31  ;;  %v1227_v55 = vld [vmem:[#allocation2 + $0xa0] sm:$0xff] }
0x18fe   :  { %v2360_v43 = vpack.c.bf16 %v1228_v42, %v1227_v55 }
0x18ff   :  { %2487 = vtanh.f32 %v1134_v32  ;;  %v1662_v32 = vld [vmem:[#allocation2 + $0xc8] sm:$0xff] }
0x1900   :  { %2361 = vmatpush3.bf16.msra.mxu0 %v2360_v43 }
0x1901   :  { %2362 = vmatprep.subr.bf16.mxu0 %v2540_v0 }
0x1904   :  { %2364 = vmatpush3.bf16.msra.mxu0 %v2363_v58 }
0x1905   :  { %2371 = vmatprep.subr.bf16.mxu0 %v2540_v0 }
0x1909   :  { %v2488_v57 = vpop.eup %2487 }
0x190a   :  { %v1136_v33 = vsub.f32 %v1042_v20, %v2488_v57 }
0x190c   :  { %1138 = vrot.lane.b32.xlu1 %v1136_v33, %s2544_s10 }
0x197e   :  { %v1139_v54 = vpop.permute.xlu1 %1138 }
0x197f   :  { %v1141_v41 = vmul.f32 %v2486_v27, %v1139_v54  ;;  %v2387_v54 = vpack.c.bf16 %v1665_v40, %v1664_v39  ;;  %v1769_v40 = vld [vmem:[#allocation2 + $0xf0] sm:$0xff] }
0x1981   :  { %1143 = vrot.lane.b32.xlu0 %v1141_v41, %s2545_s11 }
0x19f3   :  { %v1144_v45 = vpop.permute.xlu0 %1143 }
0x19f4   :  { %v1146_v29 = vadd.f32 %v2488_v57, %v1144_v45  ;;  %v1663_v57 = vld [vmem:[#allocation2 + $0xd0] sm:$0xff] }
0x19f5   :  { %v2383_v33 = vpack.c.bf16 %v1663_v57, %v1662_v32 }
0x19f6   :  { %1153 = vrot.lane.b32.xlu1 %v1146_v29, %s2543_s1 }
0x1a68   :  { %v1154_v48 = vpop.permute.xlu1 %1153 }
0x1a69   :  { %2215 = vmatmul.mubr.msk.f32.vlgmr.msra.gmra.mrb[16].mxu1 %vm316_vm3, %v1154_v48 }
0x1a6a   :  { %2367 = vmatpush3.bf16.msra.mxu1 %v2360_v43  ;;  %2236 = vmatprep.mubr.msk.f32.mxu1 %vm2541_vm0, %v2542_v1 }
0x1a6b   :  { %2368 = vmatprep.subr.bf16.mxu1 %v2540_v0 }
0x1a6e   :  { %2370 = vmatpush3.bf16.msra.mxu1 %v2363_v58 }
0x1a6f   :  { %2377 = vmatprep.subr.bf16.mxu1 %v2540_v0 }
0x1b3c   :  { %v1223_v59 = vpop.f32.mrb[16].mxu1 }
0x1b3d   :  { %v2794_v60 = vadd.f32 %v1223_v59, %v1151_v34  ;;  %v2216_v61 = vpop.f32.mrb[17].mxu1 }
0x1b3f   :  { %2226 = vmatmul.mubr.msk.f32.vlgmr.msra.gmra.mrb[26].mxu0 %vm316_vm3, %v2794_v60 }
0x1b40   :  { %2373 = vmatpush3.bf16.msra.mxu0 %v2360_v43  ;;  %2247 = vmatprep.mubr.msk.f32.mxu0 %vm2541_vm0, %v2542_v1 }
0x1b41   :  { %2374 = vmatprep.subr.bf16.mxu0 %v2540_v0 }
0x1b44   :  { %2376 = vmatpush3.bf16.msra.mxu0 %v2363_v58 }
0x1b45   :  { %2384 = vmatprep.subr.bf16.mxu0 %v2383_v33 }
0x1c12   :  { %v1301_v63 = vpop.f32.mrb[26].mxu0 }
0x1c13   :  { %v1302_v2 = vadd.f32 %v1301_v63, %v2801_v62  ;;  %v2227_v52 = vpop.f32.mrb[27].mxu0 }
0x1c15   :  { %1316 = vrot.lane.b32.xlu1 %v1302_v2, %s2544_s10  ;;  %1306 = vrot.lane.b32.xlu0 %v1302_v2, %s2545_s11 }
0x1c87   :  { %v1307_v3 = vpop.permute.xlu0 %1306  ;;  %v1317_v8 = vpop.permute.xlu1 %1316 }
0x1c88   :  { %v1309_v53 = vadd.f32 %v1307_v3, %v2794_v60 }
0x1c8a   :  { %v1937_v4 = vmul.f32 -1.442695, %v1309_v53 }
0x1c8c   :  { %2489 = vpow2.f32 %v1937_v4 }
0x1c96   :  { %v2490_v5 = vpop.eup %2489 }
0x1c97   :  { %v1313_v6 = vadd.f32 1.0, %v2490_v5 }
0x1c99   :  { %2491 = vrcp.f32 %v1313_v6 }
0x1ca3   :  { %v2492_v7 = vpop.eup %2491 }
0x1ca4   :  { %v1319_v9 = vmul.f32 %v2492_v7, %v1317_v8 }
0x1ca6   :  { %1321 = vrot.lane.b32.xlu0 %v1319_v9, %s2543_s1 }
0x1d18   :  { %v1322_v10 = vpop.permute.xlu0 %1321 }
0x1d19   :  { %v1324_v11 = vadd.f32 %v1322_v10, %v2794_v60 }
0x1d1b   :  { %2493 = vtanh.f32 %v1324_v11 }
0x1d25   :  { %v2494_v12 = vpop.eup %2493 }
0x1d26   :  { %1327 = vrot.lane.b32.xlu1 %v2494_v12, %s2545_s11 }
0x1d98   :  { %v1328_v13 = vpop.permute.xlu1 %1327 }
0x1d99   :  { %v1330_v14 = vsub.f32 %v2794_v60, %v1328_v13 }
0x1d9b   :  { %1332 = vrot.lane.b32.xlu0 %v1330_v14, %s2543_s1 }
0x1e0d   :  { %v1333_v15 = vpop.permute.xlu0 %1332 }
0x1e0e   :  { %v1335_v16 = vmul.f32 %v2492_v7, %v1333_v15 }
0x1e10   :  { %1337 = vrot.lane.b32.xlu1 %v1335_v16, %s2545_s11 }
0x1e82   :  { %v1338_v17 = vpop.permute.xlu1 %1337 }
0x1e83   :  { %v1340_v18 = vadd.f32 %v2494_v12, %v1338_v17 }
0x1e85   :  { %1342 = vrot.lane.b32.xlu0 %v1340_v18, %s2545_s11 }
0x1ef7   :  { %v1343_v19 = vpop.permute.xlu0 %1342 }
0x1ef8   :  { %2237 = vmatmul.mubr.msk.f32.vlgmr.msra.gmra.mrb[18].mxu1 %vm316_vm3, %v1343_v19 }
0x1ef9   :  { %2379 = vmatpush3.bf16.msra.mxu1 %v2360_v43  ;;  %2258 = vmatprep.mubr.msk.f32.mxu1 %vm2541_vm0, %v2542_v1 }
0x1efa   :  { %2380 = vmatprep.subr.bf16.mxu1 %v2540_v0 }
0x1efd   :  { %2382 = vmatpush3.bf16.msra.mxu1 %v2363_v58 }
0x1fcb   :  { %v1412_v20 = vpop.f32.mrb[18].mxu1 }
0x1fcc   :  { %v1413_v51 = vadd.f32 %v1412_v20, %v2801_v62  ;;  %v2238_v56 = vpop.f32.mrb[19].mxu1 }
0x1fce   :  { %1427 = vrot.lane.b32.xlu0 %v1413_v51, %s2544_s10  ;;  %1417 = vrot.lane.b32.xlu1 %v1413_v51, %s2545_s11 }
0x2040   :  { %v1418_v21 = vpop.permute.xlu1 %1417  ;;  %v1428_v26 = vpop.permute.xlu0 %1427 }
0x2041   :  { %v1420_v22 = vadd.f32 %v1418_v21, %v2794_v60 }
0x2043   :  { %v1939_v23 = vmul.f32 -1.442695, %v1420_v22 }
0x2045   :  { %2495 = vpow2.f32 %v1939_v23 }
0x204f   :  { %v2496_v24 = vpop.eup %2495 }
0x2050   :  { %v1424_v25 = vadd.f32 1.0, %v2496_v24 }
0x2052   :  { %2497 = vrcp.f32 %v1424_v25 }
0x205c   :  { %v2498_v1 = vpop.eup %2497 }
0x205d   :  { %v1430_v0 = vmul.f32 %v2498_v1, %v1428_v26 }
0x205f   :  { %1432 = vrot.lane.b32.xlu1 %v1430_v0, %s2543_s1 }
0x20d1   :  { %v1433_v27 = vpop.permute.xlu1 %1432 }
0x20d2   :  { %v1435_v28 = vadd.f32 %v1433_v27, %v2794_v60 }
0x20d4   :  { %2499 = vtanh.f32 %v1435_v28 }
0x20de   :  { %v2500_v30 = vpop.eup %2499 }
0x20df   :  { %v1437_v31 = vsub.f32 %v1340_v18, %v2500_v30 }
0x20e1   :  { %1439 = vrot.lane.b32.xlu0 %v1437_v31, %s2544_s10 }
0x2153   :  { %v1440_v35 = vpop.permute.xlu0 %1439 }
0x2154   :  { %v1442_v36 = vmul.f32 %v2498_v1, %v1440_v35 }
0x2156   :  { %1444 = vrot.lane.b32.xlu1 %v1442_v36, %s2545_s11 }
0x21c8   :  { %v1445_v37 = vpop.permute.xlu1 %1444 }
0x21c9   :  { %v1447_v38 = vadd.f32 %v2500_v30, %v1445_v37 }
0x21cb   :  { %1449 = vrot.lane.b32.xlu0 %v1447_v38, %s2545_s11 }
0x223d   :  { %v1450_v41 = vpop.permute.xlu0 %1449 }
0x223e   :  { %2248 = vmatmul.mubr.msk.f32.vlgmr.msra.gmra.mrb[28].mxu0 %vm316_vm3, %v1450_v41 }
0x223f   :  { %2386 = vmatpush3.bf16.msra.mxu0 %v2383_v33  ;;  %2269 = vmatprep.mubr.msk.f32.mxu0 %vm316_vm3, %v1343_v19 }
0x2240   :  { %2388 = vmatprep.subr.bf16.mxu0 %v2387_v54 }
0x2243   :  { %2390 = vmatpush3.bf16.msra.mxu0 %v2387_v54  ;;  %v1770_v54 = vld [vmem:[#allocation2 + $0xf8] sm:$0xff] }
0x2246   :  { %2270 = vmatmul.mubr.msk.f32.vlgmr.msra.gmra.mrb[30].mxu0 %vm316_vm3, %v1450_v41  ;;  %v1771_v41 = vld [vmem:[#allocation2 + $0x100] sm:$0xff] }
0x2311   :  { %v1519_v55 = vpop.f32.mrb[28].mxu0 }
0x2312   :  { %v1520_v42 = vadd.f32 %v1519_v55, %v2801_v62  ;;  %v2249_v43 = vpop.f32.mrb[29].mxu0  ;;  %v1773_v55 = vld [vmem:[#allocation2 + $0x110] sm:$0xff] }
0x2314   :  { %1534 = vrot.lane.b32.xlu0 %v1520_v42, %s2544_s10  ;;  %1524 = vrot.lane.b32.xlu1 %v1520_v42, %s2545_s11  ;;  %v1772_v42 = vld [vmem:[#allocation2 + $0x108] sm:$0xff] }
0x2319   :  { %v2271_v45 = vpop.f32.mrb[30].mxu0 }
0x231a   :  { %v1737_v29 = vpop.f32.mrb[31].mxu0 }
0x231b   :  { %v2416_v48 = vpack.i.bf16 %v2271_v45, %v1737_v29 }
0x2386   :  { %v1525_v49 = vpop.permute.xlu1 %1524  ;;  %v1535_v63 = vpop.permute.xlu0 %1534 }
0x2387   :  { %v1527_v50 = vadd.f32 %v1525_v49, %v2794_v60  ;;  %v1775_v49 = vld [vmem:[#allocation2 + $0x120] sm:$0xff] }
0x2389   :  { %v1941_v58 = vmul.f32 -1.442695, %v1527_v50  ;;  %v1774_v50 = vld [vmem:[#allocation2 + $0x118] sm:$0xff] }
0x238b   :  { %2501 = vpow2.f32 %v1941_v58 }
0x2395   :  { %v2502_v34 = vpop.eup %2501 }
0x2396   :  { %v1531_v59 = vadd.f32 1.0, %v2502_v34 }
0x2398   :  { %2503 = vrcp.f32 %v1531_v59 }
0x23a2   :  { %v2504_v61 = vpop.eup %2503 }
0x23a3   :  { %v1537_v2 = vmul.f32 %v2504_v61, %v1535_v63 }
0x23a5   :  { %1539 = vrot.lane.b32.xlu1 %v1537_v2, %s2543_s1 }
0x2417   :  { %v1540_v52 = vpop.permute.xlu1 %1539 }
0x2418   :  { %v1542_v3 = vadd.f32 %v1540_v52, %v2794_v60 }
0x241a   :  { %2505 = vtanh.f32 %v1542_v3 }
0x2424   :  { %v2506_v53 = vpop.eup %2505 }
0x2425   :  { %v1544_v4 = vsub.f32 %v1447_v38, %v2506_v53 }
0x2427   :  { %1546 = vrot.lane.b32.xlu0 %v1544_v4, %s2544_s10 }
0x2499   :  { %v1547_v5 = vpop.permute.xlu0 %1546 }
0x249a   :  { %v1549_v6 = vmul.f32 %v2504_v61, %v1547_v5 }
0x249c   :  { %1551 = vrot.lane.b32.xlu1 %v1549_v6, %s2545_s11 }
0x250e   :  { %v1552_v7 = vpop.permute.xlu1 %1551 }
0x250f   :  { %v1554_v8 = vadd.f32 %v2506_v53, %v1552_v7 }
0x2511   :  { %1556 = vrot.lane.b32.xlu0 %v1554_v8, %s2545_s11 }
0x2583   :  { %v1557_v9 = vpop.permute.xlu0 %1556 }
0x2584   :  { %2259 = vmatmul.mubr.msk.f32.vlgmr.msra.gmra.mrb[20].mxu1 %vm316_vm3, %v1557_v9  ;;  %2272 = vmatprep.mubr.msk.f32.mxu0 %vm316_vm3, %v1557_v9 }
0x2585   :  { %2287 = vmatprep.mubr.msk.f32.mxu1 %vm1795_vm4, %v1768_v44 }
0x2657   :  { %v1626_v10 = vpop.f32.mrb[20].mxu1 }
0x2658   :  { %v1627_v11 = vadd.f32 %v1626_v10, %v2801_v62  ;;  %v2260_v12 = vpop.f32.mrb[21].mxu1 }
0x265a   :  { %1641 = vrot.lane.b32.xlu0 %v1627_v11, %s2544_s10  ;;  %1631 = vrot.lane.b32.xlu1 %v1627_v11, %s2545_s11 }
0x26cc   :  { %v1632_v13 = vpop.permute.xlu1 %1631  ;;  %v1642_v19 = vpop.permute.xlu0 %1641 }
0x26cd   :  { %v1634_v14 = vadd.f32 %v1632_v13, %v2794_v60 }
0x26cf   :  { %v1943_v15 = vmul.f32 -1.442695, %v1634_v14 }
0x26d1   :  { %2507 = vpow2.f32 %v1943_v15 }
0x26db   :  { %v2508_v16 = vpop.eup %2507 }
0x26dc   :  { %v1638_v17 = vadd.f32 1.0, %v2508_v16 }
0x26de   :  { %2509 = vrcp.f32 %v1638_v17 }
0x26e8   :  { %v2510_v18 = vpop.eup %2509 }
0x26e9   :  { %v1644_v20 = vmul.f32 %v2510_v18, %v1642_v19 }
0x26eb   :  { %1646 = vrot.lane.b32.xlu1 %v1644_v20, %s2543_s1 }
0x275d   :  { %v1647_v51 = vpop.permute.xlu1 %1646 }
0x275e   :  { %v1649_v62 = vadd.f32 %v1647_v51, %v2794_v60 }
0x2760   :  { %2511 = vtanh.f32 %v1649_v62 }
0x276a   :  { %v2512_v56 = vpop.eup %2511 }
0x276b   :  { %v1651_v21 = vsub.f32 %v1554_v8, %v2512_v56 }
0x276d   :  { %1653 = vrot.lane.b32.xlu0 %v1651_v21, %s2544_s10 }
0x27df   :  { %v1654_v22 = vpop.permute.xlu0 %1653 }
0x27e0   :  { %v1656_v23 = vmul.f32 %v2510_v18, %v1654_v22 }
0x27e2   :  { %1658 = vrot.lane.b32.xlu1 %v1656_v23, %s2545_s11 }
0x27e6   :  { %2417 = vrot.lane.b32.xlu1 %v2416_v48, %s2546_s12 }
0x27ea   :  { %2427 = vrot.lane.b32.xlu1 %v2426_v47, %s2547_s13 }
0x2854   :  { %v1659_v24 = vpop.permute.xlu1 %1658 }
0x2855   :  { %v1661_v25 = vadd.f32 %v2512_v56, %v1659_v24 }
0x2857   :  { %1667 = vrot.lane.b32.xlu0 %v1661_v25, %s2545_s11 }
0x2858   :  { %v2418_v60 = vpop.permute.xlu1 %2417 }
0x285c   :  { %v2428_v1 = vpop.permute.xlu1 %2427 }
0x285d   :  { %v2430_v26 = vunpack.i.h.bf16 %v2428_v1  ;;  %v2429_v0 = vunpack.i.l.bf16 %v2428_v1 }
0x285f   :  { %v2391_v27 = vpack.c.bf16 %v2430_v26, %v2429_v0 }
0x2861   :  { %2392 = vmatprep.subr.bf16.mxu1 %v2391_v27 }
0x2862   :  { %2394 = vmatpush3.bf16.msra.mxu1 %v2391_v27 }
0x28c9   :  { %v1668_v28 = vpop.permute.xlu0 %1667 }
0x28ca   :  { %2273 = vmatmul.mubr.msk.f32.gmra.mrb[32].mxu0 %vm316_vm3, %v1668_v28 }
0x299d   :  { %v2274_v30 = vpop.f32.mrb[32].mxu0 }
0x299e   :  { %v1747_v31 = vpop.f32.mrb[33].mxu0 }
0x299f   :  { %v2421_v32 = vpack.i.bf16 %v2274_v30, %v1747_v31 }
0x29a1   :  { %2422 = vrot.lane.b32.xlu0 %v2421_v32, %s2546_s12 }
0x29a5   :  { %2432 = vrot.lane.b32.xlu0 %v2418_v60, %s2547_s13 }
0x2a13   :  { %v2423_v46 = vpop.permute.xlu0 %2422 }
0x2a14   :  { %2437 = vrot.lane.b32.xlu1 %v2423_v46, %s2547_s13 }
0x2a17   :  { %v2433_v47 = vpop.permute.xlu0 %2432 }
0x2a18   :  { %v2435_v57 = vunpack.i.h.bf16 %v2433_v47  ;;  %v2434_v33 = vunpack.i.l.bf16 %v2433_v47 }
0x2a1a   :  { %v2395_v35 = vpack.c.bf16 %v2435_v57, %v2434_v33 }
0x2a1c   :  { %2396 = vmatprep.subr.bf16.mxu1 %v2395_v35 }
0x2a1d   :  { %2398 = vmatpush3.bf16.msra.mxu1 %v2395_v35 }
0x2a86   :  { %v2438_v36 = vpop.permute.xlu1 %2437 }
0x2a87   :  { %v2440_v37 = vunpack.i.h.bf16 %v2438_v36  ;;  %v2439_v38 = vunpack.i.l.bf16 %v2438_v36 }
0x2a89   :  { %v2399_v39 = vpack.c.bf16 %v2440_v37, %v2439_v38 }
0x2a8b   :  { %2400 = vmatprep.subr.bf16.mxu1 %v2399_v39 }
0x2a8c   :  { %2402 = vmatpush3.bf16.msra.mxu1 %v2399_v39 }
0x2a8f   :  { %2288 = vmatmul.mubr.msk.f32.vlgmr.msra.gmra.mrb[22].mxu1 %vm1795_vm4, %v1769_v40 }
0x2a90   :  { %2290 = vmatprep.mubr.msk.f32.mxu1 %vm1795_vm4, %v1770_v54 }
0x2a93   :  { %2291 = vmatmul.mubr.msk.f32.gmra.mrb[24].mxu1 %vm1795_vm4, %v1771_v41 }
0x2b62   :  { %v2289_v43 = vpop.f32.mrb[22].mxu1 }
0x2b63   :  { %v1880_v45 = vadd.f32 %v2289_v43, %v1773_v55  ;;  %v1874_v29 = vpop.f32.mrb[23].mxu1 }
0x2b64   :  { %v1875_v48 = vadd.f32 %v1874_v29, %v1772_v42 }
0x2b65   :  { %1895 = vst.msk [vmem:[%s2872_s2 + $0x8] sm:$0xff] %vm1893_vm5, %v1880_v45 }
0x2b66   :  { %1894 = vst.msk [vmem:[%s2872_s2] sm:$0xff] %vm1893_vm5, %v1875_v48  ;;  %v2292_v58 = vpop.f32.mrb[24].mxu1 }
0x2b67   :  { %v1890_v34 = vadd.f32 %v2292_v58, %v1775_v49  ;;  %v1884_v59 = vpop.f32.mrb[25].mxu1 }
0x2b68   :  { %v1885_v61 = vadd.f32 %v1884_v59, %v1774_v50 }
0x2b69   :  { %1897 = vst.msk [vmem:[%s2872_s2 + $0x18] sm:$0xff] %vm1893_vm5, %v1890_v34 }
0x2b6a   :  { %1896 = vst.msk [vmem:[%s2872_s2 + $0x10] sm:$0xff] %vm1893_vm5, %v1885_v61 }
0x2b6b   :  { %1902 = vsyncpa [#allocation3], 1 }

</bundles_post_ra>
